<compile_context>
chip_gen: v7x
topology: tpu7x:2x2x1
jax: 0.10.0
libtpu: 0.0.40
codegen_flags: <defaults>
</compile_context>

<pallas_src>
import functools

import numpy as np
import jax
import jax.numpy as jnp
from jax.experimental import pallas as pl
from jax.experimental.pallas import tpu as pltpu

MARGIN = 150.0     # Totalloss6.margin
NCE_TEMP = 0.1     # Totalloss6.NCE temperature

_VMEM = pltpu.MemorySpace.VMEM
_SMEM = pltpu.MemorySpace.SMEM

# Row-group offsets inside the mean bank (rows = [emb, EA, HA, EB, HB] x N).
_EMB, _EA, _HA, _EB, _HB = 0, 1, 2, 3, 4


def _round_up(x, m):
    return ((x + m - 1) // m) * m


# ----------------------------------------------------------------------------
# Per-generation VMEM sizing (v5e/v6e: 128 MiB -> ~96 MiB limit; v7x: 64 MiB
# -> ~48 MiB limit), with ~80% of the limit reserved for the double-buffered
# input blocks of the stats kernel.
# ----------------------------------------------------------------------------
def _vmem_config():
    cap = 64 * 1024 * 1024
    try:
        info_fn = getattr(pltpu, "get_tpu_info", None)
        if info_fn is not None:
            cap = int(info_fn().vmem_capacity_bytes)
    except Exception:
        pass
    limit = max(16 * 1024 * 1024, (cap * 3) // 4)
    budget = (limit * 4) // 5
    return int(limit), int(budget)


_VMEM_LIMIT_BYTES, _INPUT_VMEM_BUDGET = _vmem_config()


def _choose_tiling(n, t, d, input_budget_bytes):
    """Pick tt (multiple of 8) so 5 double-buffered (n, tt, d) f32 blocks fit."""
    per_t_row_bytes = 5 * 2 * n * d * 4
    tt = max(8, (input_budget_bytes // max(per_t_row_bytes, 1)) // 8 * 8)
    half = (t + 1) // 2                       # T split into 2 parallel halves
    half_pad = _round_up(half, 8)
    tt = min(tt, half_pad)
    if half % tt == 0:
        tiles_per_half = half // tt
    else:
        best = 0
        if half % 8 == 0:                     # try an exact divisor -> no padding
            cand = tt
            while cand >= 8:
                if half % cand == 0:
                    best = cand
                    break
                cand -= 8
        if best:
            tt = best
            tiles_per_half = half // tt
        else:
            tiles_per_half = -(-half // tt)   # ceil; pad T with zeros
    t_pad = 2 * tt * tiles_per_half
    return tt, tiles_per_half, t_pad


# ----------------------------------------------------------------------------
# Kernel A: fused T-tiled stats over the five tensors (no stack).
#   inputs : emb, ea, ha, eb, hb  -> blocks (N, tt, D)
#   outputs: gram_parts (2, 2, N, N)  [half, {emb, ea}]  (Gram over T of D-mean)
#            msum_parts (2, 5, N, D)  [half, tensor]     (raw sums over T)
# Both outputs are resident accumulators across the trailing (arbitrary) axis.
# ----------------------------------------------------------------------------
def _stats_kernel(emb_ref, ea_ref, ha_ref, eb_ref, hb_ref, gram_ref, msum_ref):
    ti = pl.program_id(1)

    @pl.when(ti == 0)
    def _init():
        gram_ref[...] = jnp.zeros_like(gram_ref)
        msum_ref[...] = jnp.zeros_like(msum_ref)

    refs = (emb_ref, ea_ref, ha_ref, eb_ref, hb_ref)
    for g, r in enumerate(refs):
        x = r[...]                                         # (N, tt, D)
        msum_ref[g] = msum_ref[g] + jnp.sum(x, axis=1)     # raw T-sum; /T deferred
        if g in (_EMB, _EA):                               # only these dists used
            a = jnp.mean(x, axis=2)                        # D-mean series (N, tt)
            gi = 0 if g == _EMB else 1
            gram_ref[gi] = gram_ref[gi] + jax.lax.dot_general(
                a, a, (((1,), (1,)), ((), ())),
                preferred_element_type=jnp.float32)        # MXU partial Gram (N, N)


def _stats_call(tensors, n, tt, tiles_per_half, d):
    in_spec = pl.BlockSpec((n, tt, d), lambda h, ti: (0, h * tiles_per_half + ti, 0))
    return pl.pallas_call(
        _stats_kernel,
        out_shape=(jax.ShapeDtypeStruct((2, 2, n, n), jnp.float32),
                   jax.ShapeDtypeStruct((2, 5, n, d), jnp.float32)),
        grid_spec=pltpu.PrefetchScalarGridSpec(
            num_scalar_prefetch=0,
            grid=(2, tiles_per_half),
            in_specs=[in_spec] * 5,
            out_specs=(pl.BlockSpec((None, 2, n, n), lambda h, ti: (h, 0, 0, 0)),
                       pl.BlockSpec((None, 5, n, d), lambda h, ti: (h, 0, 0, 0)))),
        compiler_params=pltpu.CompilerParams(
            dimension_semantics=("parallel", "arbitrary"),
            vmem_limit_bytes=_VMEM_LIMIT_BYTES),
    )(*tensors)


# ----------------------------------------------------------------------------
# Kernel B: fused finalize — combine the two partial halves, cosine-distance
# matrices for emb/EA, BCE action loss, separation loss, and the zero-padded
# normalized-later mean bank (B_pad, D_pad).
# ----------------------------------------------------------------------------
def _finalize_kernel(gram_ref, msum_ref, scores_ref, label_ref,
                     dist_ref, bank_ref, scal_ref, *, t_total, n, d):
    gram = gram_ref[0] + gram_ref[1]                       # (2, N, N)
    msum = msum_ref[0] + msum_ref[1]                       # (5, N, D)
    means = msum * (1.0 / t_total)                         # single deferred /T

    # Cosine-distance matrices (emb, EA): dist_ij = 1 - G_ij / sqrt(G_ii G_jj)
    row = jax.lax.broadcasted_iota(jnp.int32, (n, n), 0)
    col = jax.lax.broadcasted_iota(jnp.int32, (n, n), 1)
    eye = row == col
    for s in range(2):
        g = gram[s]
        dsel = jnp.where(eye, g, 0.0)
        inv_c = jax.lax.rsqrt(jnp.maximum(jnp.sum(dsel, axis=1, keepdims=True), 1e-24))
        inv_r = jax.lax.rsqrt(jnp.maximum(jnp.sum(dsel, axis=0, keepdims=True), 1e-24))
        dist_ref[s] = 1.0 - g * inv_c * inv_r

    # Mean bank, zero-padded to lane-dense (B_pad, D_pad).
    bank_ref[...] = jnp.zeros_like(bank_ref)
    for g in range(5):
        bank_ref[pl.ds(g * n, n), pl.ds(0, d)] = means[g]

    # BCE action loss (faithful to reference: label / sum(label); NaN hazard
    # for all-zero rows, same as the PyTorch module).
    x = scores_ref[...]
    y = label_ref[...]
    y = y / jnp.sum(y, axis=1, keepdims=True)
    log_x = jnp.maximum(jnp.log(x), -100.0)                # BCELoss log clamp
    log_1mx = jnp.maximum(jnp.log(1.0 - x), -100.0)
    scal_ref[0] = jnp.mean(-(y * log_x + (1.0 - y) * log_1mx))

    # Separation loss.
    ma = means[_EA]
    mb = means[_EB]
    na = jnp.sqrt(jnp.sum(ma * ma, axis=1, keepdims=True))
    nb = jnp.sqrt(jnp.sum(mb * mb, axis=1, keepdims=True))
    scal_ref[1] = jnp.mean((jnp.maximum(MARGIN - na, 0.0) + nb) ** 2)


def _finalize_call(gram_parts, msum_parts, video_scores, label, n, d, t):
    b_pad = _round_up(5 * n, 128)
    d_pad = _round_up(d, 128)
    kernel = functools.partial(_finalize_kernel, t_total=float(t), n=n, d=d)
    return pl.pallas_call(
        kernel,
        out_shape=(jax.ShapeDtypeStruct((2, n, n), jnp.float32),
                   jax.ShapeDtypeStruct((b_pad, d_pad), jnp.float32),
                   jax.ShapeDtypeStruct((2,), jnp.float32)),
        in_specs=[pl.BlockSpec(memory_space=_VMEM)] * 4,
        out_specs=(pl.BlockSpec(memory_space=_VMEM),
                   pl.BlockSpec(memory_space=_VMEM),
                   pl.BlockSpec(memory_space=_SMEM)),
    )(gram_parts, msum_parts, video_scores, label)


# ----------------------------------------------------------------------------
# Kernel C: bank-based NCE for ALL contrast instances in one launch.
#   bank : (B_pad, D_pad)  mean vectors (normalized once in-kernel, rsqrt/EUP)
#   qsel : (M, B_pad) one-hot query selector      (MXU gather)
#   ksel : (M, B_pad) one-hot positive-key selector
#   mask : (M, B_pad) 1 where bank row is a negative for this instance
#   wgrp : (M, 2) group weight (col 0 = ins, col 1 = feat); padded rows = 0
# ----------------------------------------------------------------------------
def _nce_bank_kernel(bank_ref, qsel_ref, ksel_ref, mask_ref, wgrp_ref, out_ref, *, temp):
    bank = bank_ref[...]
    inv = jax.lax.rsqrt(jnp.maximum(jnp.sum(bank * bank, axis=-1, keepdims=True), 1e-24))
    bank_n = bank * inv                                    # normalized bank (once)

    qsel = qsel_ref[...]
    ksel = ksel_ref[...]
    qn = jax.lax.dot_general(qsel, bank_n, (((1,), (0,)), ((), ())),
                             preferred_element_type=jnp.float32)   # (M, D_pad)
    kn = jax.lax.dot_general(ksel, bank_n, (((1,), (0,)), ((), ())),
                             preferred_element_type=jnp.float32)

    inv_t = 1.0 / temp
    l_pos = jnp.sum(qn * kn, axis=-1, keepdims=True) * inv_t          # (M, 1)
    l_neg = jax.lax.dot_general(qn, bank_n, (((1,), (1,)), ((), ())),
                                preferred_element_type=jnp.float32) * inv_t
    l_neg = jnp.where(mask_ref[...] > 0.5, l_neg, -1e30)

    m = jnp.maximum(l_pos, jnp.max(l_neg, axis=-1, keepdims=True))
    lse = m + jnp.log(jnp.exp(l_pos - m)
                      + jnp.sum(jnp.exp(l_neg - m), axis=-1, keepdims=True))
    loss = lse - l_pos                                      # CE with label 0

    w = wgrp_ref[...]
    out_ref[0] = jnp.sum(loss * w[:, 0:1])                  # ins sum
    out_ref[1] = jnp.sum(loss * w[:, 1:2])                  # feat sum


@jax.jit
def _nce_call(bank, qsel, ksel, mask, wgrp):
    return pl.pallas_call(
        functools.partial(_nce_bank_kernel, temp=NCE_TEMP),
        out_shape=jax.ShapeDtypeStruct((2,), jnp.float32),
        in_specs=[pl.BlockSpec(memory_space=_VMEM)] * 5,
        out_specs=pl.BlockSpec(memory_space=_SMEM),
    )(bank, qsel, ksel, mask, wgrp)


# ----------------------------------------------------------------------------
# Single jitted device front-end: stats + finalize (dists, bank, scalars).
# ----------------------------------------------------------------------------
@jax.jit
def _device_front(video_scores, label, ea, eb, ha, hb, emb):
    n, t, d = ea.shape
    tt, tiles_per_half, t_pad = _choose_tiling(n, t, d, _INPUT_VMEM_BUDGET)

    def prep(x):
        x = x.astype(jnp.float32)
        if t_pad != t:
            x = jnp.pad(x, ((0, 0), (0, t_pad - t), (0, 0)))   # zeros: sums unchanged
        return x

    tensors = [prep(x) for x in (emb, ea, ha, eb, hb)]
    gram_parts, msum_parts = _stats_call(tensors, n, tt, tiles_per_half, d)
    dists, bank, scal = _finalize_call(gram_parts, msum_parts,
                                       video_scores.astype(jnp.float32),
                                       label.astype(jnp.float32), n, d, t)
    return dists, bank, scal


# ----------------------------------------------------------------------------
# Host-side glue: data-dependent selection on concrete labels / distances.
# (Mirrors the reference Python loops exactly; only builds tiny index arrays.)
# ----------------------------------------------------------------------------
def _class_sets(label_np):
    n, c = label_np.shape
    return [{i for i in range(n) if label_np[i, ci] == 1} for ci in range(c)]


def _build_instances(label_np, dist_emb, dist_ea, n):
    sets = _class_sets(label_np)
    instances = []   # (q_row, k_row, neg_rows, group)

    def row(group, j):
        return group * n + j

    # Instance-level contrast (embeddings).
    for members in sets:
        if len(members) <= 1:
            continue
        for idx in sorted(members):
            min_d = float(np.max(dist_emb[idx]))
            k_row = row(_EMB, idx)
            for j in sorted(members):
                if j != idx and dist_emb[idx, j] < min_d:
                    k_row = row(_EMB, j)
                    min_d = float(dist_emb[idx, j])
            negs = [row(_EMB, j) for j in range(n) if j not in members]
            instances.append((row(_EMB, idx), k_row, negs, 0))

    # Feature-level contrast (EA/HA vs EB/HB + other-class features).
    for members in sets:
        if len(members) <= 1:
            continue
        for idx in sorted(members):
            min_d = float(np.max(dist_ea[idx]))
            k_ea = row(_HA, idx)
            negs = []
            for j in sorted(members):
                negs.append(row(_EB, j))
                negs.append(row(_HB, j))
                if j != idx and dist_ea[idx, j] < min_d:
                    k_ea = row(_EA, j)
                    min_d = float(dist_ea[idx, j])
            for j in range(n):
                if j not in members:
                    negs.extend([row(_EA, j), row(_HA, j), row(_EB, j), row(_HB, j)])
            instances.append((row(_EA, idx), k_ea, negs, 1))            # loss_ea
            # TODO(synk): reference line `loss_ha = self.NCE(q_ha, neg_ea)` is
            # missing its `neg` argument; implemented as NCE(q_ha, k_ha, neg_ea).
            instances.append((row(_HA, idx), row(_EA, idx), negs, 1))   # loss_ha
    return instances


def _pack_selection(instances, b_pad, m_bucket):
    m = len(instances)
    assert m <= m_bucket, (m, m_bucket)
    qsel = np.zeros((m_bucket, b_pad), np.float32)
    ksel = np.zeros((m_bucket, b_pad), np.float32)
    mask = np.zeros((m_bucket, b_pad), np.float32)
    wgrp = np.zeros((m_bucket, 2), np.float32)
    for i, (q, k, negs, grp) in enumerate(instances):
        qsel[i, q] = 1.0
        ksel[i, k] = 1.0
        if negs:
            mask[i, np.asarray(negs, np.int64)] = 1.0
        wgrp[i, grp] = 1.0
    return qsel, ksel, mask, wgrp


# ----------------------------------------------------------------------------
# Full forward.
# ----------------------------------------------------------------------------
def total_loss6_forward(video_scores, label, contrast_pairs):
    label_np = np.asarray(label, np.float32)               # label stays host-resident
    label_dev = jnp.asarray(label_np)
    video_scores = jnp.asarray(video_scores, jnp.float32)

    dists, bank, scal = _device_front(
        video_scores, label_dev,
        contrast_pairs['EA'], contrast_pairs['EB'],
        contrast_pairs['HA'], contrast_pairs['HB'],
        contrast_pairs['embeddings'])
    loss_cls = scal[0]
    loss_sep = scal[1]

    # Single, small device -> host sync: only the two (N, N) distance matrices.
    dists_np = np.asarray(jax.device_get(dists))
    n, c = label_np.shape
    instances = _build_instances(label_np, dists_np[0], dists_np[1], n)

    # Static instance bucket (<= 3*N*C) -> no retrace/recompile across batches.
    m_bucket = _round_up(max(3 * n * c, 1), 8)
    qsel, ksel, mask, wgrp = _pack_selection(instances, int(bank.shape[0]), m_bucket)
    sums = _nce_call(bank, jnp.asarray(qsel), jnp.asarray(ksel),
                     jnp.asarray(mask), jnp.asarray(wgrp))
    loss_ins = sums[0] / n
    loss_feat = sums[1] / n

    loss_total = loss_cls + 0.0 * loss_sep + 0.0 * loss_feat + 0.01 * loss_ins
    loss_dict = {
        'Loss/Action': loss_cls,
        'Loss/Separation': loss_sep,
        'Loss/Ins': loss_ins,
        'Loss/Feat': loss_feat,
        'Loss/Total': loss_total,
    }
    return loss_total, loss_dict


# ----------------------------------------------------------------------------
if __name__ == "__main__":
    N, C, T, D = 4, 4, 8, 32
    key = jax.random.PRNGKey(0)
    k1, k2, k3, k4, k5, k6 = jax.random.split(key, 6)

    video_scores = jax.nn.sigmoid(jax.random.normal(k1, (N, C), jnp.float32))
    # Multi-hot labels: classes 0 and 1 have >=2 members; every sample has a label.
    label = np.array([[1, 0, 0, 1],
                      [1, 1, 0, 0],
                      [0, 1, 0, 0],
                      [0, 0, 1, 0]], dtype=np.float32)

    contrast_pairs = {
        'EA': jax.random.normal(k2, (N, T, D), jnp.float32),
        'EB': jax.random.normal(k3, (N, T, D), jnp.float32),
        'HA': jax.random.normal(k4, (N, T, D), jnp.float32),
        'HB': jax.random.normal(k5, (N, T, D), jnp.float32),
        'embeddings': jax.random.normal(k6, (N, T, D), jnp.float32),
    }

    loss_total, loss_dict = total_loss6_forward(video_scores, label, contrast_pairs)
    jax.block_until_ready(loss_total)
    for v in loss_dict.values():
        jax.block_until_ready(v)
    print("KERNEL_OK")
</pallas_src>

<mosaic_0001>
module attributes {stable_mosaic.version = 11 : i64} {
  func.func @_finalize_kernel(%arg0: memref<2x2x4x4xf32, #tpu.memory_space<vmem>>, %arg1: memref<2x5x4x32xf32, #tpu.memory_space<vmem>>, %arg2: memref<4x4xf32, #tpu.memory_space<vmem>>, %arg3: memref<4x4xf32, #tpu.memory_space<vmem>>, %arg4: memref<2x4x4xf32, #tpu.memory_space<vmem>>, %arg5: memref<128x128xf32, #tpu.memory_space<vmem>>, %arg6: memref<2xf32, #tpu.memory_space<smem>>) attributes {dimension_semantics = [], scalar_prefetch = 0 : i64, scratch_operands = 0 : i64, tpu.core_type = #tpu.core_type<tc>} {
    %c0 = arith.constant 0 : index
    %c0_0 = arith.constant 0 : index
    %c0_1 = arith.constant 0 : index
    %c0_2 = arith.constant 0 : index
    %0 = vector.load %arg0[%c0, %c0_0, %c0_1, %c0_2] : memref<2x2x4x4xf32, #tpu.memory_space<vmem>>, vector<1x2x4x4xf32>
    %1 = vector.shape_cast %0 : vector<1x2x4x4xf32> to vector<2x4x4xf32>
    %c1 = arith.constant 1 : index
    %c0_3 = arith.constant 0 : index
    %c0_4 = arith.constant 0 : index
    %c0_5 = arith.constant 0 : index
    %2 = vector.load %arg0[%c1, %c0_3, %c0_4, %c0_5] : memref<2x2x4x4xf32, #tpu.memory_space<vmem>>, vector<1x2x4x4xf32>
    %3 = vector.shape_cast %2 : vector<1x2x4x4xf32> to vector<2x4x4xf32>
    %4 = arith.addf %1, %3 : vector<2x4x4xf32>
    %c0_6 = arith.constant 0 : index
    %c0_7 = arith.constant 0 : index
    %c0_8 = arith.constant 0 : index
    %c0_9 = arith.constant 0 : index
    %5 = vector.load %arg1[%c0_6, %c0_7, %c0_8, %c0_9] : memref<2x5x4x32xf32, #tpu.memory_space<vmem>>, vector<1x5x4x32xf32>
    %6 = vector.shape_cast %5 : vector<1x5x4x32xf32> to vector<5x4x32xf32>
    %c1_10 = arith.constant 1 : index
    %c0_11 = arith.constant 0 : index
    %c0_12 = arith.constant 0 : index
    %c0_13 = arith.constant 0 : index
    %7 = vector.load %arg1[%c1_10, %c0_11, %c0_12, %c0_13] : memref<2x5x4x32xf32, #tpu.memory_space<vmem>>, vector<1x5x4x32xf32>
    %8 = vector.shape_cast %7 : vector<1x5x4x32xf32> to vector<5x4x32xf32>
    %9 = arith.addf %6, %8 : vector<5x4x32xf32>
    %cst = arith.constant 1.250000e-01 : f32
    %10 = vector.broadcast %cst : f32 to vector<5x4x32xf32>
    %11 = arith.mulf %9, %10 : vector<5x4x32xf32>
    %12 = tpu.iota {dimensions = array<i32: 0>} : vector<4x4xi32>
    %13 = tpu.iota {dimensions = array<i32: 1>} : vector<4x4xi32>
    %14 = arith.cmpi eq, %12, %13 : vector<4x4xi32>
    %15 = vector.extract_strided_slice %4 {offsets = [0, 0, 0], sizes = [1, 4, 4], strides = [1, 1, 1]} : vector<2x4x4xf32> to vector<1x4x4xf32>
    %16 = vector.shape_cast %15 : vector<1x4x4xf32> to vector<4x4xf32>
    %cst_14 = arith.constant 0.000000e+00 : f32
    %17 = vector.broadcast %cst_14 : f32 to vector<4x4xf32>
    %18 = arith.select %14, %16, %17 : vector<4x4xi1>, vector<4x4xf32>
    %cst_15 = arith.constant dense<0.000000e+00> : vector<4xf32>
    %19 = vector.multi_reduction <add>, %18, %cst_15 [1] : vector<4x4xf32> to vector<4xf32>
    %20 = vector.shape_cast %19 : vector<4xf32> to vector<4x1xf32>
    %cst_16 = arith.constant 1.000000e-24 : f32
    %21 = vector.broadcast %cst_16 : f32 to vector<4x1xf32>
    %22 = arith.maximumf %20, %21 : vector<4x1xf32>
    %23 = math.rsqrt %22 : vector<4x1xf32>
    %cst_17 = arith.constant dense<0.000000e+00> : vector<4xf32>
    %24 = vector.multi_reduction <add>, %18, %cst_17 [0] : vector<4x4xf32> to vector<4xf32>
    %25 = vector.shape_cast %24 : vector<4xf32> to vector<1x4xf32>
    %cst_18 = arith.constant 1.000000e-24 : f32
    %26 = vector.broadcast %cst_18 : f32 to vector<1x4xf32>
    %27 = arith.maximumf %25, %26 : vector<1x4xf32>
    %28 = math.rsqrt %27 : vector<1x4xf32>
    %29 = vector.broadcast %23 : vector<4x1xf32> to vector<4x4xf32>
    %30 = arith.mulf %16, %29 : vector<4x4xf32>
    %31 = vector.broadcast %28 : vector<1x4xf32> to vector<4x4xf32>
    %32 = arith.mulf %30, %31 : vector<4x4xf32>
    %cst_19 = arith.constant 1.000000e+00 : f32
    %33 = vector.broadcast %cst_19 : f32 to vector<4x4xf32>
    %34 = arith.subf %33, %32 : vector<4x4xf32>
    %c0_20 = arith.constant 0 : index
    %c0_21 = arith.constant 0 : index
    %c0_22 = arith.constant 0 : index
    %35 = vector.load %arg4[%c0_20, %c0_21, %c0_22] : memref<2x4x4xf32, #tpu.memory_space<vmem>>, vector<1x4x4xf32>
    %36 = vector.shape_cast %35 : vector<1x4x4xf32> to vector<4x4xf32>
    %37 = vector.shape_cast %34 : vector<4x4xf32> to vector<1x4x4xf32>
    tpu.vector_store %arg4[%c0_20, %c0_21, %c0_22], %37 {strides = array<i32>} : memref<2x4x4xf32, #tpu.memory_space<vmem>>, vector<1x4x4xf32>,
    %38 = vector.extract_strided_slice %4 {offsets = [1, 0, 0], sizes = [1, 4, 4], strides = [1, 1, 1]} : vector<2x4x4xf32> to vector<1x4x4xf32>
    %39 = vector.shape_cast %38 : vector<1x4x4xf32> to vector<4x4xf32>
    %cst_23 = arith.constant 0.000000e+00 : f32
    %40 = vector.broadcast %cst_23 : f32 to vector<4x4xf32>
    %41 = arith.select %14, %39, %40 : vector<4x4xi1>, vector<4x4xf32>
    %cst_24 = arith.constant dense<0.000000e+00> : vector<4xf32>
    %42 = vector.multi_reduction <add>, %41, %cst_24 [1] : vector<4x4xf32> to vector<4xf32>
    %43 = vector.shape_cast %42 : vector<4xf32> to vector<4x1xf32>
    %cst_25 = arith.constant 1.000000e-24 : f32
    %44 = vector.broadcast %cst_25 : f32 to vector<4x1xf32>
    %45 = arith.maximumf %43, %44 : vector<4x1xf32>
    %46 = math.rsqrt %45 : vector<4x1xf32>
    %cst_26 = arith.constant dense<0.000000e+00> : vector<4xf32>
    %47 = vector.multi_reduction <add>, %41, %cst_26 [0] : vector<4x4xf32> to vector<4xf32>
    %48 = vector.shape_cast %47 : vector<4xf32> to vector<1x4xf32>
    %cst_27 = arith.constant 1.000000e-24 : f32
    %49 = vector.broadcast %cst_27 : f32 to vector<1x4xf32>
    %50 = arith.maximumf %48, %49 : vector<1x4xf32>
    %51 = math.rsqrt %50 : vector<1x4xf32>
    %52 = vector.broadcast %46 : vector<4x1xf32> to vector<4x4xf32>
    %53 = arith.mulf %39, %52 : vector<4x4xf32>
    %54 = vector.broadcast %51 : vector<1x4xf32> to vector<4x4xf32>
    %55 = arith.mulf %53, %54 : vector<4x4xf32>
    %cst_28 = arith.constant 1.000000e+00 : f32
    %56 = vector.broadcast %cst_28 : f32 to vector<4x4xf32>
    %57 = arith.subf %56, %55 : vector<4x4xf32>
    %c1_29 = arith.constant 1 : index
    %c0_30 = arith.constant 0 : index
    %c0_31 = arith.constant 0 : index
    %58 = vector.load %arg4[%c1_29, %c0_30, %c0_31] : memref<2x4x4xf32, #tpu.memory_space<vmem>>, vector<1x4x4xf32>
    %59 = vector.shape_cast %58 : vector<1x4x4xf32> to vector<4x4xf32>
    %60 = vector.shape_cast %57 : vector<4x4xf32> to vector<1x4x4xf32>
    tpu.vector_store %arg4[%c1_29, %c0_30, %c0_31], %60 {strides = array<i32>} : memref<2x4x4xf32, #tpu.memory_space<vmem>>, vector<1x4x4xf32>,
    %cst_32 = arith.constant 0.000000e+00 : f32
    %61 = vector.broadcast %cst_32 : f32 to vector<128x128xf32>
    %c0_33 = arith.constant 0 : index
    %c0_34 = arith.constant 0 : index
    %62 = vector.load %arg5[%c0_33, %c0_34] : memref<128x128xf32, #tpu.memory_space<vmem>>, vector<128x128xf32>
    tpu.vector_store %arg5[%c0_33, %c0_34], %61 {strides = array<i32>} : memref<128x128xf32, #tpu.memory_space<vmem>>, vector<128x128xf32>,
    %63 = vector.extract_strided_slice %11 {offsets = [0, 0, 0], sizes = [1, 4, 32], strides = [1, 1, 1]} : vector<5x4x32xf32> to vector<1x4x32xf32>
    %64 = vector.shape_cast %63 : vector<1x4x32xf32> to vector<4x32xf32>
    %c0_35 = arith.constant 0 : index
    %c0_36 = arith.constant 0 : index
    %65 = vector.load %arg5[%c0_35, %c0_36] : memref<128x128xf32, #tpu.memory_space<vmem>>, vector<4x32xf32>
    tpu.vector_store %arg5[%c0_35, %c0_36], %64 {strides = array<i32>} : memref<128x128xf32, #tpu.memory_space<vmem>>, vector<4x32xf32>,
    %66 = vector.extract_strided_slice %11 {offsets = [1, 0, 0], sizes = [1, 4, 32], strides = [1, 1, 1]} : vector<5x4x32xf32> to vector<1x4x32xf32>
    %67 = vector.shape_cast %66 : vector<1x4x32xf32> to vector<4x32xf32>
    %c4 = arith.constant 4 : index
    %c0_37 = arith.constant 0 : index
    %68 = vector.load %arg5[%c4, %c0_37] : memref<128x128xf32, #tpu.memory_space<vmem>>, vector<4x32xf32>
    tpu.vector_store %arg5[%c4, %c0_37], %67 {strides = array<i32>} : memref<128x128xf32, #tpu.memory_space<vmem>>, vector<4x32xf32>,
    %69 = vector.extract_strided_slice %11 {offsets = [2, 0, 0], sizes = [1, 4, 32], strides = [1, 1, 1]} : vector<5x4x32xf32> to vector<1x4x32xf32>
    %70 = vector.shape_cast %69 : vector<1x4x32xf32> to vector<4x32xf32>
    %c8 = arith.constant 8 : index
    %c0_38 = arith.constant 0 : index
    %71 = vector.load %arg5[%c8, %c0_38] : memref<128x128xf32, #tpu.memory_space<vmem>>, vector<4x32xf32>
    tpu.vector_store %arg5[%c8, %c0_38], %70 {strides = array<i32>} : memref<128x128xf32, #tpu.memory_space<vmem>>, vector<4x32xf32>,
    %72 = vector.extract_strided_slice %11 {offsets = [3, 0, 0], sizes = [1, 4, 32], strides = [1, 1, 1]} : vector<5x4x32xf32> to vector<1x4x32xf32>
    %73 = vector.shape_cast %72 : vector<1x4x32xf32> to vector<4x32xf32>
    %c12 = arith.constant 12 : index
    %c0_39 = arith.constant 0 : index
    %74 = vector.load %arg5[%c12, %c0_39] : memref<128x128xf32, #tpu.memory_space<vmem>>, vector<4x32xf32>
    tpu.vector_store %arg5[%c12, %c0_39], %73 {strides = array<i32>} : memref<128x128xf32, #tpu.memory_space<vmem>>, vector<4x32xf32>,
    %75 = vector.extract_strided_slice %11 {offsets = [4, 0, 0], sizes = [1, 4, 32], strides = [1, 1, 1]} : vector<5x4x32xf32> to vector<1x4x32xf32>
    %76 = vector.shape_cast %75 : vector<1x4x32xf32> to vector<4x32xf32>
    %c16 = arith.constant 16 : index
    %c0_40 = arith.constant 0 : index
    %77 = vector.load %arg5[%c16, %c0_40] : memref<128x128xf32, #tpu.memory_space<vmem>>, vector<4x32xf32>
    tpu.vector_store %arg5[%c16, %c0_40], %76 {strides = array<i32>} : memref<128x128xf32, #tpu.memory_space<vmem>>, vector<4x32xf32>,
    %c0_41 = arith.constant 0 : index
    %c0_42 = arith.constant 0 : index
    %78 = vector.load %arg2[%c0_41, %c0_42] : memref<4x4xf32, #tpu.memory_space<vmem>>, vector<4x4xf32>
    %c0_43 = arith.constant 0 : index
    %c0_44 = arith.constant 0 : index
    %79 = vector.load %arg3[%c0_43, %c0_44] : memref<4x4xf32, #tpu.memory_space<vmem>>, vector<4x4xf32>
    %cst_45 = arith.constant dense<0.000000e+00> : vector<4xf32>
    %80 = vector.multi_reduction <add>, %79, %cst_45 [1] : vector<4x4xf32> to vector<4xf32>
    %81 = vector.shape_cast %80 : vector<4xf32> to vector<4x1xf32>
    %82 = vector.broadcast %81 : vector<4x1xf32> to vector<4x4xf32>
    %83 = arith.divf %79, %82 : vector<4x4xf32>
    %84 = math.log %78 : vector<4x4xf32>
    %cst_46 = arith.constant -1.000000e+02 : f32
    %85 = vector.broadcast %cst_46 : f32 to vector<4x4xf32>
    %86 = arith.maximumf %84, %85 : vector<4x4xf32>
    %cst_47 = arith.constant 1.000000e+00 : f32
    %87 = vector.broadcast %cst_47 : f32 to vector<4x4xf32>
    %88 = arith.subf %87, %78 : vector<4x4xf32>
    %89 = math.log %88 : vector<4x4xf32>
    %cst_48 = arith.constant -1.000000e+02 : f32
    %90 = vector.broadcast %cst_48 : f32 to vector<4x4xf32>
    %91 = arith.maximumf %89, %90 : vector<4x4xf32>
    %92 = arith.mulf %83, %86 : vector<4x4xf32>
    %cst_49 = arith.constant 1.000000e+00 : f32
    %93 = vector.broadcast %cst_49 : f32 to vector<4x4xf32>
    %94 = arith.subf %93, %83 : vector<4x4xf32>
    %95 = arith.mulf %94, %91 : vector<4x4xf32>
    %96 = arith.addf %92, %95 : vector<4x4xf32>
    %cst_50 = arith.constant 0.000000e+00 : f32
    %97 = vector.broadcast %cst_50 : f32 to vector<4x4xf32>
    %98 = arith.subf %97, %96 : vector<4x4xf32>
    %99 = vector.shape_cast %98 : vector<4x4xf32> to vector<1x4x4xf32>
    %cst_51 = arith.constant dense<0.000000e+00> : vector<1xf32>
    %100 = vector.multi_reduction <add>, %99, %cst_51 [1, 2] : vector<1x4x4xf32> to vector<1xf32>
    %101 = vector.shape_cast %100 : vector<1xf32> to vector<1x1x1xf32>
    %102 = vector.extract %101[0, 0, 0] : f32 from vector<1x1x1xf32>
    %cst_52 = arith.constant 1.600000e+01 : f32
    %103 = arith.divf %102, %cst_52 : f32
    %c0_53 = arith.constant 0 : index
    %104 = memref.load %arg6[%c0_53] : memref<2xf32, #tpu.memory_space<smem>>
    memref.store %103, %arg6[%c0_53] : memref<2xf32, #tpu.memory_space<smem>>
    %105 = vector.extract_strided_slice %11 {offsets = [1, 0, 0], sizes = [1, 4, 32], strides = [1, 1, 1]} : vector<5x4x32xf32> to vector<1x4x32xf32>
    %106 = vector.shape_cast %105 : vector<1x4x32xf32> to vector<4x32xf32>
    %107 = vector.extract_strided_slice %11 {offsets = [3, 0, 0], sizes = [1, 4, 32], strides = [1, 1, 1]} : vector<5x4x32xf32> to vector<1x4x32xf32>
    %108 = vector.shape_cast %107 : vector<1x4x32xf32> to vector<4x32xf32>
    %109 = arith.mulf %106, %106 : vector<4x32xf32>
    %cst_54 = arith.constant dense<0.000000e+00> : vector<4xf32>
    %110 = vector.multi_reduction <add>, %109, %cst_54 [1] : vector<4x32xf32> to vector<4xf32>
    %111 = vector.shape_cast %110 : vector<4xf32> to vector<4x1xf32>
    %112 = math.sqrt %111 : vector<4x1xf32>
    %113 = arith.mulf %108, %108 : vector<4x32xf32>
    %cst_55 = arith.constant dense<0.000000e+00> : vector<4xf32>
    %114 = vector.multi_reduction <add>, %113, %cst_55 [1] : vector<4x32xf32> to vector<4xf32>
    %115 = vector.shape_cast %114 : vector<4xf32> to vector<4x1xf32>
    %116 = math.sqrt %115 : vector<4x1xf32>
    %cst_56 = arith.constant 1.500000e+02 : f32
    %117 = vector.broadcast %cst_56 : f32 to vector<4x1xf32>
    %118 = arith.subf %117, %112 : vector<4x1xf32>
    %cst_57 = arith.constant 0.000000e+00 : f32
    %119 = vector.broadcast %cst_57 : f32 to vector<4x1xf32>
    %120 = arith.maximumf %118, %119 : vector<4x1xf32>
    %121 = arith.addf %120, %116 : vector<4x1xf32>
    %122 = arith.mulf %121, %121 : vector<4x1xf32>
    %123 = vector.shape_cast %122 : vector<4x1xf32> to vector<1x4x1xf32>
    %cst_58 = arith.constant dense<0.000000e+00> : vector<1xf32>
    %124 = vector.multi_reduction <add>, %123, %cst_58 [1, 2] : vector<1x4x1xf32> to vector<1xf32>
    %125 = vector.shape_cast %124 : vector<1xf32> to vector<1x1x1xf32>
    %126 = vector.extract %125[0, 0, 0] : f32 from vector<1x1x1xf32>
    %cst_59 = arith.constant 4.000000e+00 : f32
    %127 = arith.divf %126, %cst_59 : f32
    %c1_60 = arith.constant 1 : index
    %128 = memref.load %arg6[%c1_60] : memref<2xf32, #tpu.memory_space<smem>>
    memref.store %127, %arg6[%c1_60] : memref<2xf32, #tpu.memory_space<smem>>
    return
  }
}

module attributes {stable_mosaic.version = 11 : i64} {
  func.func @_stats_kernel(%arg0: i32, %arg1: i32, %arg2: memref<4x8x32xf32, #tpu.memory_space<vmem>>, %arg3: memref<4x8x32xf32, #tpu.memory_space<vmem>>, %arg4: memref<4x8x32xf32, #tpu.memory_space<vmem>>, %arg5: memref<4x8x32xf32, #tpu.memory_space<vmem>>, %arg6: memref<4x8x32xf32, #tpu.memory_space<vmem>>, %arg7: memref<1x2x4x4xf32, #tpu.memory_space<vmem>>, %arg8: memref<1x5x4x32xf32, #tpu.memory_space<vmem>>) attributes {dimension_semantics = [#tpu.dimension_semantics<parallel>, #tpu.dimension_semantics<arbitrary>], iteration_bounds = array<i64: 2, 1>, scalar_prefetch = 0 : i64, scratch_operands = 0 : i64, tpu.core_type = #tpu.core_type<tc>, window_params = [{transform_indices = @transform_0, window_bounds = array<i64: 4, 8, 32>}, {transform_indices = @transform_1, window_bounds = array<i64: 4, 8, 32>}, {transform_indices = @transform_2, window_bounds = array<i64: 4, 8, 32>}, {transform_indices = @transform_3, window_bounds = array<i64: 4, 8, 32>}, {transform_indices = @transform_4, window_bounds = array<i64: 4, 8, 32>}, {transform_indices = @transform_5, window_bounds = array<i64: 1, 2, 4, 4>}, {transform_indices = @transform_6, window_bounds = array<i64: 1, 5, 4, 32>}]} {
    %c0_i32 = arith.constant 0 : i32
    %0 = arith.cmpi eq, %arg1, %c0_i32 : i32
    %1 = arith.extui %0 : i1 to i32
    %c0_i32_0 = arith.constant 0 : i32
    %2 = arith.cmpi ne, %1, %c0_i32_0 : i32
    scf.if %2 {
      %cst_77 = arith.constant 0.000000e+00 : f32
      %63 = vector.broadcast %cst_77 : f32 to vector<2x4x4xf32>
      %c0_78 = arith.constant 0 : index
      %c0_79 = arith.constant 0 : index
      %c0_80 = arith.constant 0 : index
      %c0_81 = arith.constant 0 : index
      %64 = vector.load %arg7[%c0_78, %c0_79, %c0_80, %c0_81] : memref<1x2x4x4xf32, #tpu.memory_space<vmem>>, vector<1x2x4x4xf32>
      %65 = vector.shape_cast %64 : vector<1x2x4x4xf32> to vector<2x4x4xf32>
      %66 = vector.shape_cast %63 : vector<2x4x4xf32> to vector<1x2x4x4xf32>
      tpu.vector_store %arg7[%c0_78, %c0_79, %c0_80, %c0_81], %66 {strides = array<i32>} : memref<1x2x4x4xf32, #tpu.memory_space<vmem>>, vector<1x2x4x4xf32>,
      %cst_82 = arith.constant 0.000000e+00 : f32
      %67 = vector.broadcast %cst_82 : f32 to vector<5x4x32xf32>
      %c0_83 = arith.constant 0 : index
      %c0_84 = arith.constant 0 : index
      %c0_85 = arith.constant 0 : index
      %c0_86 = arith.constant 0 : index
      %68 = vector.load %arg8[%c0_83, %c0_84, %c0_85, %c0_86] : memref<1x5x4x32xf32, #tpu.memory_space<vmem>>, vector<1x5x4x32xf32>
      %69 = vector.shape_cast %68 : vector<1x5x4x32xf32> to vector<5x4x32xf32>
      %70 = vector.shape_cast %67 : vector<5x4x32xf32> to vector<1x5x4x32xf32>
      tpu.vector_store %arg8[%c0_83, %c0_84, %c0_85, %c0_86], %70 {strides = array<i32>} : memref<1x5x4x32xf32, #tpu.memory_space<vmem>>, vector<1x5x4x32xf32>,
    } else {
    }
    %c0 = arith.constant 0 : index
    %c0_1 = arith.constant 0 : index
    %c0_2 = arith.constant 0 : index
    %3 = vector.load %arg2[%c0, %c0_1, %c0_2] : memref<4x8x32xf32, #tpu.memory_space<vmem>>, vector<4x8x32xf32>
    %c0_3 = arith.constant 0 : index
    %c0_4 = arith.constant 0 : index
    %c0_5 = arith.constant 0 : index
    %c0_6 = arith.constant 0 : index
    %4 = vector.load %arg8[%c0_3, %c0_4, %c0_5, %c0_6] : memref<1x5x4x32xf32, #tpu.memory_space<vmem>>, vector<1x1x4x32xf32>
    %5 = vector.shape_cast %4 : vector<1x1x4x32xf32> to vector<4x32xf32>
    %cst = arith.constant dense<0.000000e+00> : vector<4x32xf32>
    %6 = vector.multi_reduction <add>, %3, %cst [1] : vector<4x8x32xf32> to vector<4x32xf32>
    %7 = arith.addf %5, %6 : vector<4x32xf32>
    %c0_7 = arith.constant 0 : index
    %c0_8 = arith.constant 0 : index
    %c0_9 = arith.constant 0 : index
    %c0_10 = arith.constant 0 : index
    %8 = vector.load %arg8[%c0_7, %c0_8, %c0_9, %c0_10] : memref<1x5x4x32xf32, #tpu.memory_space<vmem>>, vector<1x1x4x32xf32>
    %9 = vector.shape_cast %8 : vector<1x1x4x32xf32> to vector<4x32xf32>
    %10 = vector.shape_cast %7 : vector<4x32xf32> to vector<1x1x4x32xf32>
    tpu.vector_store %arg8[%c0_7, %c0_8, %c0_9, %c0_10], %10 {strides = array<i32>} : memref<1x5x4x32xf32, #tpu.memory_space<vmem>>, vector<1x1x4x32xf32>,
    %cst_11 = arith.constant dense<0.000000e+00> : vector<4x8xf32>
    %11 = vector.multi_reduction <add>, %3, %cst_11 [2] : vector<4x8x32xf32> to vector<4x8xf32>
    %cst_12 = arith.constant 3.200000e+01 : f32
    %12 = vector.broadcast %cst_12 : f32 to vector<4x8xf32>
    %13 = arith.divf %11, %12 : vector<4x8xf32>
    %c0_13 = arith.constant 0 : index
    %c0_14 = arith.constant 0 : index
    %c0_15 = arith.constant 0 : index
    %c0_16 = arith.constant 0 : index
    %14 = vector.load %arg7[%c0_13, %c0_14, %c0_15, %c0_16] : memref<1x2x4x4xf32, #tpu.memory_space<vmem>>, vector<1x1x4x4xf32>
    %15 = vector.shape_cast %14 : vector<1x1x4x4xf32> to vector<4x4xf32>
    %cst_17 = arith.constant dense<0.000000e+00> : vector<4x4xf32>
    %16 = tpu.matmul %13, %13, %cst_17 {dimension_numbers = #tpu.dot_dimension_numbers<[1], [1], [0], [0], [0, 0, 1, 0], [], []>} : vector<4x8xf32>, vector<4x8xf32>, vector<4x4xf32> -> vector<4x4xf32>
    %17 = arith.addf %15, %16 : vector<4x4xf32>
    %c0_18 = arith.constant 0 : index
    %c0_19 = arith.constant 0 : index
    %c0_20 = arith.constant 0 : index
    %c0_21 = arith.constant 0 : index
    %18 = vector.load %arg7[%c0_18, %c0_19, %c0_20, %c0_21] : memref<1x2x4x4xf32, #tpu.memory_space<vmem>>, vector<1x1x4x4xf32>
    %19 = vector.shape_cast %18 : vector<1x1x4x4xf32> to vector<4x4xf32>
    %20 = vector.shape_cast %17 : vector<4x4xf32> to vector<1x1x4x4xf32>
    tpu.vector_store %arg7[%c0_18, %c0_19, %c0_20, %c0_21], %20 {strides = array<i32>} : memref<1x2x4x4xf32, #tpu.memory_space<vmem>>, vector<1x1x4x4xf32>,
    %c0_22 = arith.constant 0 : index
    %c0_23 = arith.constant 0 : index
    %c0_24 = arith.constant 0 : index
    %21 = vector.load %arg3[%c0_22, %c0_23, %c0_24] : memref<4x8x32xf32, #tpu.memory_space<vmem>>, vector<4x8x32xf32>
    %c0_25 = arith.constant 0 : index
    %c1 = arith.constant 1 : index
    %c0_26 = arith.constant 0 : index
    %c0_27 = arith.constant 0 : index
    %22 = vector.load %arg8[%c0_25, %c1, %c0_26, %c0_27] : memref<1x5x4x32xf32, #tpu.memory_space<vmem>>, vector<1x1x4x32xf32>
    %23 = vector.shape_cast %22 : vector<1x1x4x32xf32> to vector<4x32xf32>
    %cst_28 = arith.constant dense<0.000000e+00> : vector<4x32xf32>
    %24 = vector.multi_reduction <add>, %21, %cst_28 [1] : vector<4x8x32xf32> to vector<4x32xf32>
    %25 = arith.addf %23, %24 : vector<4x32xf32>
    %c0_29 = arith.constant 0 : index
    %c1_30 = arith.constant 1 : index
    %c0_31 = arith.constant 0 : index
    %c0_32 = arith.constant 0 : index
    %26 = vector.load %arg8[%c0_29, %c1_30, %c0_31, %c0_32] : memref<1x5x4x32xf32, #tpu.memory_space<vmem>>, vector<1x1x4x32xf32>
    %27 = vector.shape_cast %26 : vector<1x1x4x32xf32> to vector<4x32xf32>
    %28 = vector.shape_cast %25 : vector<4x32xf32> to vector<1x1x4x32xf32>
    tpu.vector_store %arg8[%c0_29, %c1_30, %c0_31, %c0_32], %28 {strides = array<i32>} : memref<1x5x4x32xf32, #tpu.memory_space<vmem>>, vector<1x1x4x32xf32>,
    %cst_33 = arith.constant dense<0.000000e+00> : vector<4x8xf32>
    %29 = vector.multi_reduction <add>, %21, %cst_33 [2] : vector<4x8x32xf32> to vector<4x8xf32>
    %cst_34 = arith.constant 3.200000e+01 : f32
    %30 = vector.broadcast %cst_34 : f32 to vector<4x8xf32>
    %31 = arith.divf %29, %30 : vector<4x8xf32>
    %c0_35 = arith.constant 0 : index
    %c1_36 = arith.constant 1 : index
    %c0_37 = arith.constant 0 : index
    %c0_38 = arith.constant 0 : index
    %32 = vector.load %arg7[%c0_35, %c1_36, %c0_37, %c0_38] : memref<1x2x4x4xf32, #tpu.memory_space<vmem>>, vector<1x1x4x4xf32>
    %33 = vector.shape_cast %32 : vector<1x1x4x4xf32> to vector<4x4xf32>
    %cst_39 = arith.constant dense<0.000000e+00> : vector<4x4xf32>
    %34 = tpu.matmul %31, %31, %cst_39 {dimension_numbers = #tpu.dot_dimension_numbers<[1], [1], [0], [0], [0, 0, 1, 0], [], []>} : vector<4x8xf32>, vector<4x8xf32>, vector<4x4xf32> -> vector<4x4xf32>
    %35 = arith.addf %33, %34 : vector<4x4xf32>
    %c0_40 = arith.constant 0 : index
    %c1_41 = arith.constant 1 : index
    %c0_42 = arith.constant 0 : index
    %c0_43 = arith.constant 0 : index
    %36 = vector.load %arg7[%c0_40, %c1_41, %c0_42, %c0_43] : memref<1x2x4x4xf32, #tpu.memory_space<vmem>>, vector<1x1x4x4xf32>
    %37 = vector.shape_cast %36 : vector<1x1x4x4xf32> to vector<4x4xf32>
    %38 = vector.shape_cast %35 : vector<4x4xf32> to vector<1x1x4x4xf32>
    tpu.vector_store %arg7[%c0_40, %c1_41, %c0_42, %c0_43], %38 {strides = array<i32>} : memref<1x2x4x4xf32, #tpu.memory_space<vmem>>, vector<1x1x4x4xf32>,
    %c0_44 = arith.constant 0 : index
    %c0_45 = arith.constant 0 : index
    %c0_46 = arith.constant 0 : index
    %39 = vector.load %arg4[%c0_44, %c0_45, %c0_46] : memref<4x8x32xf32, #tpu.memory_space<vmem>>, vector<4x8x32xf32>
    %c0_47 = arith.constant 0 : index
    %c2 = arith.constant 2 : index
    %c0_48 = arith.constant 0 : index
    %c0_49 = arith.constant 0 : index
    %40 = vector.load %arg8[%c0_47, %c2, %c0_48, %c0_49] : memref<1x5x4x32xf32, #tpu.memory_space<vmem>>, vector<1x1x4x32xf32>
    %41 = vector.shape_cast %40 : vector<1x1x4x32xf32> to vector<4x32xf32>
    %cst_50 = arith.constant dense<0.000000e+00> : vector<4x32xf32>
    %42 = vector.multi_reduction <add>, %39, %cst_50 [1] : vector<4x8x32xf32> to vector<4x32xf32>
    %43 = arith.addf %41, %42 : vector<4x32xf32>
    %c0_51 = arith.constant 0 : index
    %c2_52 = arith.constant 2 : index
    %c0_53 = arith.constant 0 : index
    %c0_54 = arith.constant 0 : index
    %44 = vector.load %arg8[%c0_51, %c2_52, %c0_53, %c0_54] : memref<1x5x4x32xf32, #tpu.memory_space<vmem>>, vector<1x1x4x32xf32>
    %45 = vector.shape_cast %44 : vector<1x1x4x32xf32> to vector<4x32xf32>
    %46 = vector.shape_cast %43 : vector<4x32xf32> to vector<1x1x4x32xf32>
    tpu.vector_store %arg8[%c0_51, %c2_52, %c0_53, %c0_54], %46 {strides = array<i32>} : memref<1x5x4x32xf32, #tpu.memory_space<vmem>>, vector<1x1x4x32xf32>,
    %c0_55 = arith.constant 0 : index
    %c0_56 = arith.constant 0 : index
    %c0_57 = arith.constant 0 : index
    %47 = vector.load %arg5[%c0_55, %c0_56, %c0_57] : memref<4x8x32xf32, #tpu.memory_space<vmem>>, vector<4x8x32xf32>
    %c0_58 = arith.constant 0 : index
    %c3 = arith.constant 3 : index
    %c0_59 = arith.constant 0 : index
    %c0_60 = arith.constant 0 : index
    %48 = vector.load %arg8[%c0_58, %c3, %c0_59, %c0_60] : memref<1x5x4x32xf32, #tpu.memory_space<vmem>>, vector<1x1x4x32xf32>
    %49 = vector.shape_cast %48 : vector<1x1x4x32xf32> to vector<4x32xf32>
    %cst_61 = arith.constant dense<0.000000e+00> : vector<4x32xf32>
    %50 = vector.multi_reduction <add>, %47, %cst_61 [1] : vector<4x8x32xf32> to vector<4x32xf32>
    %51 = arith.addf %49, %50 : vector<4x32xf32>
    %c0_62 = arith.constant 0 : index
    %c3_63 = arith.constant 3 : index
    %c0_64 = arith.constant 0 : index
    %c0_65 = arith.constant 0 : index
    %52 = vector.load %arg8[%c0_62, %c3_63, %c0_64, %c0_65] : memref<1x5x4x32xf32, #tpu.memory_space<vmem>>, vector<1x1x4x32xf32>
    %53 = vector.shape_cast %52 : vector<1x1x4x32xf32> to vector<4x32xf32>
    %54 = vector.shape_cast %51 : vector<4x32xf32> to vector<1x1x4x32xf32>
    tpu.vector_store %arg8[%c0_62, %c3_63, %c0_64, %c0_65], %54 {strides = array<i32>} : memref<1x5x4x32xf32, #tpu.memory_space<vmem>>, vector<1x1x4x32xf32>,
    %c0_66 = arith.constant 0 : index
    %c0_67 = arith.constant 0 : index
    %c0_68 = arith.constant 0 : index
    %55 = vector.load %arg6[%c0_66, %c0_67, %c0_68] : memref<4x8x32xf32, #tpu.memory_space<vmem>>, vector<4x8x32xf32>
    %c0_69 = arith.constant 0 : index
    %c4 = arith.constant 4 : index
    %c0_70 = arith.constant 0 : index
    %c0_71 = arith.constant 0 : index
    %56 = vector.load %arg8[%c0_69, %c4, %c0_70, %c0_71] : memref<1x5x4x32xf32, #tpu.memory_space<vmem>>, vector<1x1x4x32xf32>
    %57 = vector.shape_cast %56 : vector<1x1x4x32xf32> to vector<4x32xf32>
    %cst_72 = arith.constant dense<0.000000e+00> : vector<4x32xf32>
    %58 = vector.multi_reduction <add>, %55, %cst_72 [1] : vector<4x8x32xf32> to vector<4x32xf32>
    %59 = arith.addf %57, %58 : vector<4x32xf32>
    %c0_73 = arith.constant 0 : index
    %c4_74 = arith.constant 4 : index
    %c0_75 = arith.constant 0 : index
    %c0_76 = arith.constant 0 : index
    %60 = vector.load %arg8[%c0_73, %c4_74, %c0_75, %c0_76] : memref<1x5x4x32xf32, #tpu.memory_space<vmem>>, vector<1x1x4x32xf32>
    %61 = vector.shape_cast %60 : vector<1x1x4x32xf32> to vector<4x32xf32>
    %62 = vector.shape_cast %59 : vector<4x32xf32> to vector<1x1x4x32xf32>
    tpu.vector_store %arg8[%c0_73, %c4_74, %c0_75, %c0_76], %62 {strides = array<i32>} : memref<1x5x4x32xf32, #tpu.memory_space<vmem>>, vector<1x1x4x32xf32>,
    return
  }
  func.func @transform_0(%arg0: i32, %arg1: i32) -> (i32, i32, i32) {
    %c1_i32 = arith.constant 1 : i32
    %0 = arith.muli %arg0, %c1_i32 : i32
    %1 = arith.addi %0, %arg1 : i32
    %c0_i32 = arith.constant 0 : i32
    %c0_i32_0 = arith.constant 0 : i32
    %c0_i32_1 = arith.constant 0 : i32
    return %c0_i32, %1, %c0_i32_0 : i32, i32, i32
  }
  func.func @transform_1(%arg0: i32, %arg1: i32) -> (i32, i32, i32) {
    %c1_i32 = arith.constant 1 : i32
    %0 = arith.muli %arg0, %c1_i32 : i32
    %1 = arith.addi %0, %arg1 : i32
    %c0_i32 = arith.constant 0 : i32
    %c0_i32_0 = arith.constant 0 : i32
    %c0_i32_1 = arith.constant 0 : i32
    return %c0_i32, %1, %c0_i32_0 : i32, i32, i32
  }
  func.func @transform_2(%arg0: i32, %arg1: i32) -> (i32, i32, i32) {
    %c1_i32 = arith.constant 1 : i32
    %0 = arith.muli %arg0, %c1_i32 : i32
    %1 = arith.addi %0, %arg1 : i32
    %c0_i32 = arith.constant 0 : i32
    %c0_i32_0 = arith.constant 0 : i32
    %c0_i32_1 = arith.constant 0 : i32
    return %c0_i32, %1, %c0_i32_0 : i32, i32, i32
  }
  func.func @transform_3(%arg0: i32, %arg1: i32) -> (i32, i32, i32) {
    %c1_i32 = arith.constant 1 : i32
    %0 = arith.muli %arg0, %c1_i32 : i32
    %1 = arith.addi %0, %arg1 : i32
    %c0_i32 = arith.constant 0 : i32
    %c0_i32_0 = arith.constant 0 : i32
    %c0_i32_1 = arith.constant 0 : i32
    return %c0_i32, %1, %c0_i32_0 : i32, i32, i32
  }
  func.func @transform_4(%arg0: i32, %arg1: i32) -> (i32, i32, i32) {
    %c1_i32 = arith.constant 1 : i32
    %0 = arith.muli %arg0, %c1_i32 : i32
    %1 = arith.addi %0, %arg1 : i32
    %c0_i32 = arith.constant 0 : i32
    %c0_i32_0 = arith.constant 0 : i32
    %c0_i32_1 = arith.constant 0 : i32
    return %c0_i32, %1, %c0_i32_0 : i32, i32, i32
  }
  func.func @transform_5(%arg0: i32, %arg1: i32) -> (i32, i32, i32, i32) {
    %c0_i32 = arith.constant 0 : i32
    %c0_i32_0 = arith.constant 0 : i32
    %c0_i32_1 = arith.constant 0 : i32
    %c0_i32_2 = arith.constant 0 : i32
    return %arg0, %c0_i32, %c0_i32_0, %c0_i32_1 : i32, i32, i32, i32
  }
  func.func @transform_6(%arg0: i32, %arg1: i32) -> (i32, i32, i32, i32) {
    %c0_i32 = arith.constant 0 : i32
    %c0_i32_0 = arith.constant 0 : i32
    %c0_i32_1 = arith.constant 0 : i32
    %c0_i32_2 = arith.constant 0 : i32
    return %arg0, %c0_i32, %c0_i32_0, %c0_i32_1 : i32, i32, i32, i32
  }
}

</mosaic_0001>

<bundles_post_ra>
// kernel: _device_front.3
= control target key start
LH: loop header
LB: loop body
LE: loop exit
PB: predicated region body
PF: predicated region fallthrough
CT: control target
= control target key end

     0   :  { %12 = vsyncpa [#allocation3], 0  ;;  %s475_s0 = inlined_call_operand.vmem [shape: f32[2,2,4,4], index: 0, kind: input, shape index: {}]   ;;  %s476_s1 = inlined_call_operand.vmem [shape: f32[2,5,4,32], index: 1, kind: input, shape index: {}]   ;;  %s477_s2 = inlined_call_operand.vmem [shape: f32[4,4], index: 2, kind: input, shape index: {}]   ;;  %s478_s3 = inlined_call_operand.vmem [shape: f32[4,4], index: 3, kind: input, shape index: {}]   ;;  %s479_s4 = inlined_call_operand.hbm [shape: f32[2,4,4], index: 4, kind: output, shape index: {0}]   ;;  %s480_s5 = inlined_call_operand.hbm [shape: f32[128,128], index: 5, kind: output, shape index: {1}]   ;;  %s481_s6 = inlined_call_operand.hbm [shape: f32[2], index: 6, kind: output, shape index: {2}]  }
   0x1   :  { %13 = vsyncpa [#allocation6], 0  ;;  %v33_v0 = vld [vmem:[%s476_s1 + $0xc] sm:$0xf]  ;;  %v34_v1 = vld [vmem:[%s476_s1 + $0x10] sm:$0xf] }
   0x2   :  { %v241_v2 = vld [vmem:[%s476_s1 + $0x1c] sm:$0xf]  ;;  %v242_v3 = vld [vmem:[%s476_s1 + $0x20] sm:$0xf]  ;;  %v243_v4 = vld [vmem:[%s476_s1 + $0x24] sm:$0xf] }
   0x3   :  { %v44_v5 = vadd.f32 %v242_v3, %v33_v0  ;;  %v45_v6 = vadd.f32 %v243_v4, %v34_v1  ;;  %v334_v7 = vmov 0.0   ;;  %v32_v8 = vld [vmem:[%s476_s1 + $0x8] sm:$0xf]  ;;  %v31_v9 = vld [vmem:[%s476_s1 + $0x4] sm:$0xf] }
   0x4   :  { %95 = vst [vmem:[#allocation5 + $0x8] sm:$0xff] %v334_v7  ;;  %96 = vst [vmem:[#allocation5 + $0x10] sm:$0xff] %v334_v7  ;;  %v239_v10 = vld [vmem:[%s476_s1 + $0x14] sm:$0xf]  ;;  %v43_v11 = vadd.f32 %v241_v2, %v32_v8  ;;  %v240_v12 = vld [vmem:[%s476_s1 + $0x18] sm:$0xf] }
   0x5   :  { %94 = vst [vmem:[#allocation5] sm:$0xff] %v334_v7  ;;  %97 = vst [vmem:[#allocation5 + $0x18] sm:$0xff] %v334_v7  ;;  %v30_v13 = vld [vmem:[%s476_s1] sm:$0xf]  ;;  %v49_v14 = vmul.f32 0.125, %v44_v5  ;;  %v50_v15 = vmul.f32 0.125, %v45_v6  ;;  %v42_v16 = vadd.f32 %v240_v12, %v31_v9 }
   0x6   :  { %98 = vst [vmem:[#allocation5 + $0x20] sm:$0xff] %v334_v7  ;;  %99 = vst [vmem:[#allocation5 + $0x28] sm:$0xff] %v334_v7  ;;  %v41_v17 = vadd.f32 %v239_v10, %v30_v13 }
   0x7   :  { %100 = vst [vmem:[#allocation5 + $0x30] sm:$0xff] %v334_v7  ;;  %101 = vst [vmem:[#allocation5 + $0x38] sm:$0xff] %v334_v7 }
   0x8   :  { %102 = vst [vmem:[#allocation5 + $0x40] sm:$0xff] %v334_v7  ;;  %103 = vst [vmem:[#allocation5 + $0x48] sm:$0xff] %v334_v7 }
   0x9   :  { %104 = vst [vmem:[#allocation5 + $0x50] sm:$0xff] %v334_v7  ;;  %105 = vst [vmem:[#allocation5 + $0x58] sm:$0xff] %v334_v7 }
   0xa   :  { %106 = vst [vmem:[#allocation5 + $0x60] sm:$0xff] %v334_v7  ;;  %107 = vst [vmem:[#allocation5 + $0x68] sm:$0xff] %v334_v7 }
   0xb   :  { %108 = vst [vmem:[#allocation5 + $0x70] sm:$0xff] %v334_v7  ;;  %109 = vst [vmem:[#allocation5 + $0x78] sm:$0xff] %v334_v7 }
   0xc   :  { %14 = vsyncpa [#allocation4], 0  ;;  %vm110_vm0 = vcmask 257024   ;;  %v48_v18 = vmul.f32 0.125, %v43_v11  ;;  %v161_v19 = vmul.f32 %v49_v14, %v49_v14  ;;  %v47_v20 = vmul.f32 0.125, %v42_v16 }
   0xd   :  { %115 = vst.msk [vmem:[#allocation5 + $0x10] sm:$0xf] %vm110_vm0, %v50_v15  ;;  %114 = vst.msk [vmem:[#allocation5 + $0xc] sm:$0xf] %vm110_vm0, %v49_v14  ;;  %v46_v21 = vmul.f32 0.125, %v41_v17  ;;  %vm57_vm1 = vcmask 27648   ;;  %v51_v38 = vlaneseq }
   0xe   :  { %113 = vst.msk [vmem:[#allocation5 + $0x8] sm:$0xf] %vm110_vm0, %v48_v18  ;;  %v162_v22 = vsel %vm110_vm0, %v161_v19, 0.0  ;;  %v150_v23 = vmul.f32 %v47_v20, %v47_v20  ;;  %112 = vst.msk [vmem:[#allocation5 + $0x4] sm:$0xf] %vm110_vm0, %v47_v20  ;;  %vm176_vm7 = vcmask 3072  }
   0xf   :  { %111 = vst.msk [vmem:[#allocation5] sm:$0xf] %vm110_vm0, %v46_v21  ;;  %163 = vadd.xlane.f32.xlu1 %v162_v22  ;;  %v117_v24 = vld [vmem:[%s478_s3] sm:$0xf]  ;;  %v52_v47 = vshrl.u32 %v51_v38, 7  ;;  %v54_v53 = vand.u32 127, %v51_v38 }
  0x10   :  { %v151_v25 = vsel %vm110_vm0, %v150_v23, 0.0  ;;  %v118_v26 = vsel %vm57_vm1, %v117_v24, 0.0  ;;  %v116_v27 = vld [vmem:[%s477_s2] sm:$0xf]  ;;  %v24_v51 = vld [vmem:[%s475_s0 + $0x4] sm:$0xf] }
  0x11   :  { %152 = vadd.xlane.f32.xlu0 %v151_v25  ;;  %v126_v28 = vsub.f32 1.0, %v116_v27  ;;  %256 = vlog2.f32 %v116_v27  ;;  %v238_v52 = vld [vmem:[%s475_s0 + $0xc] sm:$0xf]  ;;  %v23_v55 = vld [vmem:[%s475_s0] sm:$0xf]  ;;  %vm55_vm6 = vcmp.eq.s32.totalorder %v52_v47, %v54_v53 }
  0x12   :  { %v237_v58 = vld [vmem:[%s475_s0 + $0x8] sm:$0xf]  ;;  %v426_v60 = vadd.f32 %v238_v52, %v24_v51  ;;  %s335_s0 = smov [#allocation5]  }
  0x13   :  { %258 = vlog2.f32 %v126_v28  ;;  %v428_v0 = vadd.f32 %v237_v58, %v23_v55  ;;  %s209_s26 = sshll.u32 %s335_s0, 4  ;;  %s210_s26 = int_to_ptr.vmem [resolvable:$true] %s209_s26 }
  0x14   :  { %v75_v3 = vsel %vm55_vm6, %v426_v60, 0.0  ;;  %s274_s27 = scalar_lea.vmem %s210_s26, 2048  ;;  %p279_p1 = scmp.lt.s32.totalorder %s210_s26, %s210_s26 }
  0x15   :  { %119 = vadd.xlane.f32.xlu0 %v118_v26  ;;  %v56_v6 = vsel %vm55_vm6, %v428_v0, 0.0  ;;  %v76_v8 = vsel %vm57_vm1, %v75_v3, 0.0  ;;  %p275_p0 = scmp.ne.s32.totalorder %s210_s26, %s274_s27  ;;  %p280_p2 = scmp.lt.s32.totalorder %s274_s27, %s274_s27 }
  0x16   :  { %v58_v9 = vsel %vm57_vm1, %v56_v6, 0.0 }
  0x17   :  { %p281_p3 = por %p280_p2, %p279_p1 }
  0x19   :  { %p282_p4 = pnand %p281_p3, %p275_p0 }
  0x1b   :  { %v257_v32 = vpop.eup %256 }
  0x1c   :  { %v124_v35 = vmul.f32 0.6931472, %v257_v32 }
  0x1d   :  { %v259_v33 = vpop.eup %258 }
  0x1e   :  { %v128_v37 = vmul.f32 0.6931472, %v259_v33  ;;  %v125_v43 = vmax.f32 %v124_v35, -100.0 }
  0x20   :  { %v129_v46 = vmax.f32 %v128_v37, -100.0 }
  0x9c   :  { %v164_v29 = vpop.xlane.xlu1 %163 }
  0x9d   :  { %260 = vrsqrt.f32 %v164_v29  ;;  %vm167_vm4 = vcmp.eq.f32.partialorder %v164_v29, inf  ;;  %v170_v54 = vand.u32 2147483648, %v164_v29  ;;  %vm169_vm5 = vcmp.eq.f32.partialorder %v164_v29, 0.0 }
  0x9e   :  { %v153_v30 = vpop.xlane.xlu0 %152 }
  0x9f   :  { %262 = vrsqrt.f32 %v153_v30  ;;  %vm156_vm2 = vcmp.eq.f32.partialorder %v153_v30, inf  ;;  %v159_v41 = vand.u32 2147483648, %v153_v30  ;;  %vm158_vm3 = vcmp.eq.f32.partialorder %v153_v30, 0.0 }
  0xa2   :  { %v120_v31 = vpop.xlane.xlu0 %119 }
  0xa3   :  { %264 = vrcp.f32 %v120_v31 }
  0xa7   :  { %v261_v34 = vpop.eup %260 }
  0xa8   :  { %v166_v40 = vmul.f32 %v261_v34, %v164_v29 }
  0xa9   :  { %v263_v36 = vpop.eup %262 }
  0xaa   :  { %v155_v39 = vmul.f32 %v263_v36, %v153_v30  ;;  %v168_v48 = vsel %vm167_vm4, %v164_v29, %v166_v40 }
  0xab   :  { %v171_v59 = vsel %vm169_vm5, %v170_v54, %v168_v48 }
  0xac   :  { %v157_v42 = vsel %vm156_vm2, %v153_v30, %v155_v39 }
  0xad   :  { %v265_v44 = vpop.eup %264  ;;  %v160_v45 = vsel %vm158_vm3, %v159_v41, %v157_v42 }
  0xae   :  { %v172_v49 = vsub.f32 150.0, %v160_v45  ;;  %v122_v50 = vmul.f32 %v265_v44, %v117_v24 }
  0xb0   :  { %v173_v56 = vmax.f32 %v172_v49, 0.0  ;;  %v131_v57 = vsub.f32 1.0, %v122_v50  ;;  %v130_v62 = vmul.f32 %v125_v43, %v122_v50 }
  0xb2   :  { %v174_v61 = vadd.f32 %v173_v56, %v171_v59  ;;  %v132_v63 = vmul.f32 %v131_v57, %v129_v46 }
  0xb4   :  { %v175_v1 = vmul.f32 %v174_v61, %v174_v61  ;;  %v133_v2 = vadd.f32 %v132_v63, %v130_v62 }
  0xb6   :  { %v177_v4 = vsel %vm176_vm7, %v175_v1, 0.0  ;;  %v134_v5 = vsub.f32 0.0, %v133_v2 }
  0xb7   :  { %178 = vadd.xlane.f32.xlu0 %v177_v4 }
  0xb8   :  { %v135_v7 = vsel %vm57_vm1, %v134_v5, 0.0 }
  0xb9   :  { %136 = vadd.xlane.f32.xlu1 %v135_v7 }
  0xbb   :  { %77 = vadd.xlane.f32.xlu0 %v76_v8 }
  0xbd   :  { %59 = vadd.xlane.f32.xlu1 %v58_v9 }
  0xbe   :  { %285 = shalt.err (!%p282_p4)
}
  0xbf   :  { %s286_s30 = scalar_lea.hbm %s480_s5, 2048 }
  0xc0   :  { %p287_p5 = scmp.ne.s32.totalorder %s480_s5, %s286_s30  ;;  %p290_p6 = scmp.lt.u32.totalorder %s286_s30, %s480_s5 }
  0xc2   :  { %p292_p7 = pnand %p290_p6, %p287_p5 }
  0xc4   :  { %295 = shalt.err (!%p292_p7)
}
  0xc5   :  { %s336_s11 = smov 128   ;;  %s337_s12 = smov 8   ;;  %v81_v10 = vrot.slane %v76_v8, 4  ;;  %v63_v11 = vrot.slane %v58_v9, 4 }
  0xc6   :  { %215 = dma.vmem_to_hbm [thread:$0]  %s210_s26, 2048, %s480_s5, [#allocation6], %s336_s11, %s336_s11, %s337_s12  }
  0xc7   :  { %v82_v12 = vadd.f32 %v81_v10, %v76_v8  ;;  %v64_v13 = vadd.f32 %v63_v11, %v58_v9  ;;  %s338_s5 = smov [#allocation2]  }
  0xc8   :  { %s197_s15 = sshll.u32 %s338_s5, 4  ;;  %s198_s15 = int_to_ptr.vmem [resolvable:$true] %s197_s15 }
  0xc9   :  { %v83_v14 = vrot.slane %v82_v12, 2  ;;  %v65_v15 = vrot.slane %v64_v13, 2  ;;  %s296_s16 = scalar_lea.vmem %s198_s15, 128  ;;  %p301_p9 = scmp.lt.s32.totalorder %s198_s15, %s198_s15 }
  0xca   :  { %p297_p8 = scmp.ne.s32.totalorder %s198_s15, %s296_s16  ;;  %p302_p10 = scmp.lt.s32.totalorder %s296_s16, %s296_s16 }
  0xcb   :  { %v84_v16 = vadd.f32 %v83_v14, %v82_v12  ;;  %v66_v17 = vadd.f32 %v65_v15, %v64_v13 }
  0xcc   :  { %p303_p11 = por %p302_p10, %p301_p9 }
  0xcd   :  { %v85_v18 = vrot.slane %v84_v16, 1  ;;  %v67_v19 = vrot.slane %v66_v17, 1 }
  0xce   :  { %p304_p12 = pnand %p303_p11, %p297_p8 }
  0xcf   :  { %v86_v20 = vadd.f32 %v85_v18, %v84_v16  ;;  %v68_v21 = vadd.f32 %v67_v19, %v66_v17 }
  0xd1   :  { %v87_v24 = vmax.f32 %v86_v20, 1e-24  ;;  %v69_v28 = vmax.f32 %v68_v21, 1e-24 }
  0xd3   :  { %266 = vrsqrt.f32 %v87_v24 }
  0xdd   :  { %v267_v42 = vpop.eup %266 }
 0x144   :  { %v179_v22 = vpop.xlane.xlu0 %178 }
 0x145   :  { %v180_v23 = vrot.slane %v179_v22, 4 }
 0x146   :  { %v137_v25 = vpop.xlane.xlu1 %136 }
 0x147   :  { %v181_v26 = vadd.f32 %v180_v23, %v179_v22  ;;  %v138_v27 = vrot.slane %v137_v25, 4 }
 0x148   :  { %v78_v29 = vpop.xlane.xlu0 %77 }
 0x149   :  { %v182_v30 = vrot.slane %v181_v26, 2  ;;  %v139_v31 = vadd.f32 %v138_v27, %v137_v25  ;;  %v79_v32 = vmax.f32 %v78_v29, 1e-24 }
 0x14a   :  { %v60_v33 = vpop.xlane.xlu1 %59 }
 0x14b   :  { %v140_v34 = vrot.slane %v139_v31, 2  ;;  %v183_v35 = vadd.f32 %v182_v30, %v181_v26  ;;  %268 = vrsqrt.f32 %v79_v32  ;;  %v61_v36 = vmax.f32 %v60_v33, 1e-24 }
 0x14c   :  { %270 = vrsqrt.f32 %v69_v28 }
 0x14d   :  { %v141_v37 = vadd.f32 %v140_v34, %v139_v31  ;;  %272 = vrsqrt.f32 %v61_v36  ;;  %v184_v38 = vrot.slane %v183_v35, 1 }
 0x14f   :  { %v142_v39 = vrot.slane %v141_v37, 1  ;;  %v185_v41 = vadd.f32 %v184_v38, %v183_v35 }
 0x151   :  { %v143_v40 = vadd.f32 %v142_v39, %v141_v37 }
 0x153   :  { %244 = vpush %v143_v40 }
 0x154   :  { %246 = vpush %v185_v41 }
 0x155   :  { %v269_v43 = vpop.eup %268 }
 0x156   :  { %v271_v44 = vpop.eup %270  ;;  %v89_v45 = vmul.f32 %v269_v43, %v426_v60 }
 0x157   :  { %v273_v46 = vpop.eup %272 }
 0x158   :  { %v71_v47 = vmul.f32 %v273_v46, %v428_v0  ;;  %v90_v48 = vmul.f32 %v267_v42, %v89_v45 }
 0x15a   :  { %v72_v49 = vmul.f32 %v271_v44, %v71_v47  ;;  %v91_v50 = vsub.f32 1.0, %v90_v48 }
 0x15c   :  { %v73_v51 = vsub.f32 1.0, %v72_v49  ;;  %93 = vst.msk [vmem:[#allocation2 + $0x4] sm:$0xf] %vm57_vm1, %v91_v50 }
 0x15e   :  { %74 = vst.msk [vmem:[#allocation2] sm:$0xf] %vm57_vm1, %v73_v51 }
 0x15f   :  { %307 = shalt.err (!%p304_p12)
}
 0x160   :  { %s308_s18 = scalar_lea.hbm %s479_s4, 128 }
 0x161   :  { %p309_p13 = scmp.ne.s32.totalorder %s479_s4, %s308_s18  ;;  %p312_p0 = scmp.lt.u32.totalorder %s308_s18, %s479_s4 }
 0x163   :  { %p314_p1 = pnand %p312_p0, %p309_p13 }
 0x165   :  { %317 = shalt.err (!%p314_p1)
}
 0x166   :  { %s339_s21 = smov 64   ;;  %s340_s22 = smov 4  }
 0x167   :  { %203 = dma.vmem_to_hbm [thread:$0]  %s198_s15, 128, %s479_s4, [#allocation3], %s339_s21, %s339_s21, %s340_s22  }
 0x168   :  { %s318_s30 = scalar_lea.hbm %s481_s6, 16 }
 0x169   :  { %p319_p2 = scmp.ne.s32.totalorder %s481_s6, %s318_s30  ;;  %p322_p3 = scmp.lt.u32.totalorder %s318_s30, %s481_s6 }
 0x16b   :  { %p324_p4 = pnand %p322_p3, %p319_p2 }
 0x184   :  { %s245_s25 = spop %244 }
 0x185   :  { %s147_s0 = smul.f32 0.0625, %s245_s25  ;;  %s247_s26 = spop %246 }
 0x186   :  { %s189_s27 = smul.f32 0.25, %s247_s26 }
 0x187   :  { %149 = sst [smem:[#allocation7]] %s147_s0 }
 0x188   :  { %191 = sst [smem:[#allocation7 + $0x1]] %s189_s27 }
 0x189   :  { %327 = shalt.err (!%p324_p4)
}
 0x18a   :  { %s341_s4 = smov [#allocation7]  }
 0x18b   :  { %223 = dma.smem_to_hbm %s341_s4, 16, %s481_s6, [#allocation4]  }
 0x18c   :  { %328 = dma.done.wait [#allocation3], 128  }
 0x18d   :  { %329 = vsyncadd [#allocation3], 4294967168 }
 0x18e   :  { %330 = dma.done.wait [#allocation6], 2048  }
 0x18f   :  { %331 = vsyncadd [#allocation6], 4294965248 }
 0x190   :  { %332 = dma.done.wait [#allocation4], 16  }
 0x191   :  { %333 = vsyncadd [#allocation4], 4294967280 }
 0x192   :  { %233 = sfence }
 0x193   :  { %234 = vsyncpa [#allocation3], 1 }
 0x194   :  { %235 = vsyncpa [#allocation6], 1 }
 0x195   :  { %236 = vsyncpa [#allocation4], 1 }

// kernel: _device_front.2
= control target key start
LH: loop header
LB: loop body
LE: loop exit
PB: predicated region body
PF: predicated region fallthrough
CT: control target
= control target key end

     0   :  { %s1423_s21 = smov 0   ;;  %s1425_s22 = smov 0   ;;  %s1653_s0 = inlined_call_operand.vmem [shape: f32[4,16,32], index: 0, kind: input, shape index: {}]   ;;  %s1654_s1 = inlined_call_operand.vmem [shape: f32[4,16,32], index: 1, kind: input, shape index: {}]   ;;  %s1655_s2 = inlined_call_operand.vmem [shape: f32[4,16,32], index: 2, kind: input, shape index: {}]   ;;  %s1656_s3 = inlined_call_operand.vmem [shape: f32[4,16,32], index: 3, kind: input, shape index: {}]   ;;  %s1657_s4 = inlined_call_operand.vmem [shape: f32[4,16,32], index: 4, kind: input, shape index: {}]   ;;  %s1658_s5 = inlined_call_operand.vmem [shape: f32[2,2,4,4], index: 5, kind: output, shape index: {0}]   ;;  %s1659_s6 = inlined_call_operand.vmem [shape: f32[2,5,4,32], index: 6, kind: output, shape index: {1}]  }
   0x1   :  { %s1427_s23 = smov 0   ;;  %s1429_s24 = smov 0  }
   0x2   :  { %s1431_s25 = smov 0  }
   0x3 LB: > { %s29_s26 = sadd.s32 1, %s1380_s24  ;;  %p45_p1 = scmp.ne.s32.totalorder %s1372_s22, %s1368_s21  ;;  %s1384_s25 = sphi %s1431_s25, %s17_s25   ;;  %s1380_s24 = sphi %s1429_s24, %s1664_s24   ;;  %s1376_s23 = sphi %s1427_s23, %s1663_s23   ;;  %s1372_s22 = sphi %s1425_s22, %s1662_s22   ;;  %s1368_s21 = sphi %s1423_s21, %s1661_s21  }
   0x4   : > { %p31_p0 = scmp.ge.s32.totalorder %s29_s26, 2  ;;  %p46_p2 = scmp.eq.s32.totalorder %s1384_s25, 0 }
   0x5   : > { %s38_s29 = sadd.s32 1, %s1372_s22  ;;  %p1252_p5 = scmp.ge.s32.totalorder %s1384_s25, 2 }
   0x6   : > { %s1666_s26 = smov (%p31_p0, %s29_s26), 0  ;;  %p1454_p3 = por %p46_p2, %p45_p1 }
   0x7   : > { %s35_s28 = ssub.s32 %s1380_s24, %s1666_s26  ;;  %235 = sbr.rel (%p1252_p5) target bundleno = 49 (0x31), region = 16 }
   0x8   : > { %p36_p4 = scmp.eq.s32.totalorder %s35_s28, 0 }
   0xa   : > { %s1462_s30 = scalar_select %p36_p4, %s1372_s22, %s38_s29  }
   0xe   : > { %238 = sbr.rel (!%p1454_p3) target bundleno = 21 (0x15), region = 20  ;;  %s240_s7 = sand.u32 (%p1454_p3), 1, %s1372_s22  }
   0xf   : > { %s1254_s8 = sshll.u32 (%p1454_p3), %s1380_s24, 3  ;;  %s1253_s9 = sshll.u32 (%p1454_p3), %s240_s7, 5 }
  0x10   : > { %s245_s12 = scalar_lea.vmem (%p1454_p3), %s1653_s0, %s1254_s8  ;;  %s242_s13 = scalar_lea.vmem (%p1454_p3), [#allocation2], %s1253_s9 }
  0x11   : > { %v279_v0 = vld [vmem:[%s245_s12] sm:$0xff] (%p1454_p3)  ;;  %v281_v1 = vld [vmem:[%s245_s12 + $0x10] sm:$0xff] (%p1454_p3) }
  0x12   : > { %v283_v2 = vld [vmem:[%s245_s12 + $0x20] sm:$0xff] (%p1454_p3)  ;;  %280 = vst [vmem:[%s242_s13] sm:$0xff] (%p1454_p3), %v279_v0  ;;  %282 = vst [vmem:[%s242_s13 + $0x8] sm:$0xff] (%p1454_p3), %v281_v1  ;;  %v285_v3 = vld [vmem:[%s245_s12 + $0x30] sm:$0xff] (%p1454_p3) }
  0x13   : > { %284 = vst [vmem:[%s242_s13 + $0x10] sm:$0xff] (%p1454_p3), %v283_v2  ;;  %286 = vst [vmem:[%s242_s13 + $0x18] sm:$0xff] (%p1454_p3), %v285_v3 }
  0x15 PF: > { %292 = sbr.rel (!%p1454_p3) target bundleno = 28 (0x1c), region = 58  ;;  %s294_s14 = sand.u32 (%p1454_p3), 1, %s1372_s22  }
  0x16   : > { %s1256_s15 = sshll.u32 (%p1454_p3), %s1380_s24, 3  ;;  %s1255_s16 = sshll.u32 (%p1454_p3), %s294_s14, 5 }
  0x17   : > { %s299_s19 = scalar_lea.vmem (%p1454_p3), %s1654_s1, %s1256_s15  ;;  %s296_s20 = scalar_lea.vmem (%p1454_p3), [#allocation3], %s1255_s16 }
  0x18   : > { %v333_v4 = vld [vmem:[%s299_s19] sm:$0xff] (%p1454_p3)  ;;  %v335_v5 = vld [vmem:[%s299_s19 + $0x10] sm:$0xff] (%p1454_p3) }
  0x19   : > { %v337_v6 = vld [vmem:[%s299_s19 + $0x20] sm:$0xff] (%p1454_p3)  ;;  %334 = vst [vmem:[%s296_s20] sm:$0xff] (%p1454_p3), %v333_v4  ;;  %336 = vst [vmem:[%s296_s20 + $0x8] sm:$0xff] (%p1454_p3), %v335_v5  ;;  %v339_v7 = vld [vmem:[%s299_s19 + $0x30] sm:$0xff] (%p1454_p3) }
  0x1a   : > { %338 = vst [vmem:[%s296_s20 + $0x10] sm:$0xff] (%p1454_p3), %v337_v6  ;;  %340 = vst [vmem:[%s296_s20 + $0x18] sm:$0xff] (%p1454_p3), %v339_v7 }
  0x1c PF: > { %346 = sbr.rel (!%p1454_p3) target bundleno = 35 (0x23), region = 96  ;;  %s348_s28 = sand.u32 (%p1454_p3), 1, %s1372_s22  }
  0x1d   : > { %s1258_s29 = sshll.u32 (%p1454_p3), %s1380_s24, 3  ;;  %s1257_s7 = sshll.u32 (%p1454_p3), %s348_s28, 5 }
  0x1e   : > { %s353_s10 = scalar_lea.vmem (%p1454_p3), %s1655_s2, %s1258_s29  ;;  %s350_s11 = scalar_lea.vmem (%p1454_p3), [#allocation4], %s1257_s7 }
  0x1f   : > { %v387_v8 = vld [vmem:[%s353_s10] sm:$0xff] (%p1454_p3)  ;;  %v389_v9 = vld [vmem:[%s353_s10 + $0x10] sm:$0xff] (%p1454_p3) }
  0x20   : > { %v391_v10 = vld [vmem:[%s353_s10 + $0x20] sm:$0xff] (%p1454_p3)  ;;  %388 = vst [vmem:[%s350_s11] sm:$0xff] (%p1454_p3), %v387_v8  ;;  %390 = vst [vmem:[%s350_s11 + $0x8] sm:$0xff] (%p1454_p3), %v389_v9  ;;  %v393_v11 = vld [vmem:[%s353_s10 + $0x30] sm:$0xff] (%p1454_p3) }
  0x21   : > { %392 = vst [vmem:[%s350_s11 + $0x10] sm:$0xff] (%p1454_p3), %v391_v10  ;;  %394 = vst [vmem:[%s350_s11 + $0x18] sm:$0xff] (%p1454_p3), %v393_v11 }
  0x23 PF: > { %400 = sbr.rel (!%p1454_p3) target bundleno = 42 (0x2a), region = 134  ;;  %s402_s12 = sand.u32 (%p1454_p3), 1, %s1372_s22  }
  0x24   : > { %s1260_s13 = sshll.u32 (%p1454_p3), %s1380_s24, 3  ;;  %s1259_s14 = sshll.u32 (%p1454_p3), %s402_s12, 5 }
  0x25   : > { %s407_s17 = scalar_lea.vmem (%p1454_p3), %s1656_s3, %s1260_s13  ;;  %s404_s18 = scalar_lea.vmem (%p1454_p3), [#allocation5], %s1259_s14 }
  0x26   : > { %v441_v12 = vld [vmem:[%s407_s17] sm:$0xff] (%p1454_p3)  ;;  %v443_v13 = vld [vmem:[%s407_s17 + $0x10] sm:$0xff] (%p1454_p3) }
  0x27   : > { %v445_v14 = vld [vmem:[%s407_s17 + $0x20] sm:$0xff] (%p1454_p3)  ;;  %442 = vst [vmem:[%s404_s18] sm:$0xff] (%p1454_p3), %v441_v12  ;;  %444 = vst [vmem:[%s404_s18 + $0x8] sm:$0xff] (%p1454_p3), %v443_v13  ;;  %v447_v15 = vld [vmem:[%s407_s17 + $0x30] sm:$0xff] (%p1454_p3) }
  0x28   : > { %446 = vst [vmem:[%s404_s18 + $0x10] sm:$0xff] (%p1454_p3), %v445_v14  ;;  %448 = vst [vmem:[%s404_s18 + $0x18] sm:$0xff] (%p1454_p3), %v447_v15 }
  0x2a PF: > { %454 = sbr.rel (!%p1454_p3) target bundleno = 49 (0x31), region = 172  ;;  %s456_s19 = sand.u32 (%p1454_p3), 1, %s1372_s22  }
  0x2b   : > { %s1262_s20 = sshll.u32 (%p1454_p3), %s1380_s24, 3  ;;  %s1261_s28 = sshll.u32 (%p1454_p3), %s456_s19, 5 }
  0x2c   : > { %s461_s8 = scalar_lea.vmem (%p1454_p3), %s1657_s4, %s1262_s20  ;;  %s458_s9 = scalar_lea.vmem (%p1454_p3), [#allocation6], %s1261_s28 }
  0x2d   : > { %v495_v16 = vld [vmem:[%s461_s8] sm:$0xff] (%p1454_p3)  ;;  %v497_v17 = vld [vmem:[%s461_s8 + $0x10] sm:$0xff] (%p1454_p3) }
  0x2e   : > { %v499_v18 = vld [vmem:[%s461_s8 + $0x20] sm:$0xff] (%p1454_p3)  ;;  %496 = vst [vmem:[%s458_s9] sm:$0xff] (%p1454_p3), %v495_v16  ;;  %498 = vst [vmem:[%s458_s9 + $0x8] sm:$0xff] (%p1454_p3), %v497_v17  ;;  %v501_v19 = vld [vmem:[%s461_s8 + $0x30] sm:$0xff] (%p1454_p3) }
  0x2f   : > { %500 = vst [vmem:[%s458_s9 + $0x10] sm:$0xff] (%p1454_p3), %v499_v18  ;;  %502 = vst [vmem:[%s458_s9 + $0x18] sm:$0xff] (%p1454_p3), %v501_v19 }
  0x31 PF: > { %p1263_p6 = scmp.ge.s32.totalorder %s1384_s25, 1  ;;  %p507_p7 = scmp.lt.s32.totalorder %s1384_s25, 3 }
  0x33   : > { %p508_p8 = pnand %p1263_p6, %p507_p7 }
  0x34   : > { %s514_s27 = sand.u32 (!%p508_p8), 1, %s1368_s21   ;;  %vm625_vm0 = vcmask (!%p508_p8), 261120   ;;  %vm658_vm1 = vcmask (!%p508_p8), 1041409   ;;  %vm660_vm2 = vcmask (!%p508_p8), 1042434   ;;  %vm662_vm3 = vcmask (!%p508_p8), 1043459   ;;  %p597_p9 = scmp.lt.s32.totalorder (!%p508_p8), %s1376_s23, 1 }
  0x35   : > { %511 = sbr.rel (%p508_p8) target bundleno = 453 (0x1c5), region = 210  ;;  %s1503_s10 = sshll.u32 (!%p508_p8), %s514_s27, 5  ;;  %vm1387_vm4 = vmmov (!%p508_p8), 0   ;;  %vm611_vm5 = vcmask (!%p508_p8), 27648   ;;  %vm614_vm6 = vcmask (!%p508_p8), 257024   ;;  %vm707_vm7 = vcmask (!%p508_p8), 64512  }
  0x36   : > { %s1506_s11 = scalar_lea.vmem (!%p508_p8), [#allocation3], %s1503_s10  ;;  %s530_s12 = scalar_lea.vmem (!%p508_p8), [#allocation4], %s1503_s10 }
  0x37   : > { %v783_v20 = vld [vmem:[%s1506_s11] sm:$0xff] (!%p508_p8)  ;;  %v939_v22 = vld [vmem:[%s530_s12 + $0x8] sm:$0xff] (!%p508_p8)  ;;  %v940_v24 = vld [vmem:[%s530_s12 + $0x10] sm:$0xff] (!%p508_p8)  ;;  %s537_s21 = scalar_lea.vmem (!%p508_p8), [#allocation5], %s1503_s10  ;;  %s544_s13 = scalar_lea.vmem (!%p508_p8), [#allocation6], %s1503_s10 }
  0x38   : > { %v938_v21 = vld [vmem:[%s530_s12] sm:$0xff] (!%p508_p8)  ;;  %v1511_v23 = vsel (!%p508_p8), %vm625_vm0, %v783_v20, 0.0  ;;  %v941_v25 = vld [vmem:[%s530_s12 + $0x18] sm:$0xff] (!%p508_p8)  ;;  %v951_v27 = vsel (!%p508_p8), %vm625_vm0, %v939_v22, 0.0  ;;  %v958_v31 = vsel (!%p508_p8), %vm625_vm0, %v940_v24, 0.0  ;;  %v983_v33 = vld [vmem:[%s537_s21 + $0x8] sm:$0xff] (!%p508_p8) }
  0x39   : > { %v944_v26 = vsel (!%p508_p8), %vm625_vm0, %v938_v21, 0.0  ;;  %v982_v28 = vld [vmem:[%s537_s21] sm:$0xff] (!%p508_p8)  ;;  %v952_v30 = vrot.slane (!%p508_p8), %v951_v27, 4  ;;  %v965_v32 = vsel (!%p508_p8), %vm625_vm0, %v941_v25, 0.0  ;;  %v984_v34 = vld [vmem:[%s537_s21 + $0x10] sm:$0xff] (!%p508_p8)  ;;  %827 = vadd.xlane.f32.xlu1 (!%p508_p8), %v1511_v23  ;;  %v959_v35 = vrot.slane (!%p508_p8), %v958_v31, 4 }
  0x3a   : > { %v945_v29 = vrot.slane (!%p508_p8), %v944_v26, 4  ;;  %v966_v36 = vrot.slane (!%p508_p8), %v965_v32, 4  ;;  %v985_v37 = vld [vmem:[%s537_s21 + $0x18] sm:$0xff] (!%p508_p8)  ;;  %v988_v38 = vsel (!%p508_p8), %vm625_vm0, %v982_v28, 0.0  ;;  %v995_v39 = vsel (!%p508_p8), %vm625_vm0, %v983_v33, 0.0  ;;  %v1026_v5 = vld [vmem:[%s544_s13] sm:$0xff] (!%p508_p8) }
  0x3b   : > { %v953_v41 = vadd.f32 (!%p508_p8), %v952_v30, %v951_v27  ;;  %v989_v42 = vrot.slane (!%p508_p8), %v988_v38, 4  ;;  %v996_v43 = vrot.slane (!%p508_p8), %v995_v39, 4  ;;  %v960_v44 = vadd.f32 (!%p508_p8), %v959_v35, %v958_v31  ;;  %v1027_v6 = vld [vmem:[%s544_s13 + $0x8] sm:$0xff] (!%p508_p8)  ;;  %v1028_v7 = vld [vmem:[%s544_s13 + $0x10] sm:$0xff] (!%p508_p8)  ;;  %v1029_v12 = vld [vmem:[%s544_s13 + $0x18] sm:$0xff] (!%p508_p8)  ;;  %s1528_s14 = scalar_lea.vmem (!%p508_p8), [#allocation2], %s1503_s10 }
  0x3c   : > { %v946_v40 = vadd.f32 %v945_v29, %v944_v26  ;;  %v967_v45 = vadd.f32 %v966_v36, %v965_v32  ;;  %v1002_v46 = vsel %vm625_vm0, %v984_v34, 0.0  ;;  %v1009_v47 = vsel %vm625_vm0, %v985_v37, 0.0  ;;  %v620_v13 = vld [vmem:[%s1528_s14] sm:$0xff]  ;;  %v784_v27 = vld [vmem:[%s1506_s11 + $0x8] sm:$0xff]  ;;  %s1668_s23 = smov (!%p597_p9, %s1376_s23), 1 }
  0x3d   : > { %v954_v49 = vrot.slane %v953_v41, 2  ;;  %v990_v50 = vadd.f32 %v989_v42, %v988_v38  ;;  %v997_v51 = vadd.f32 %v996_v43, %v995_v39  ;;  %v961_v52 = vrot.slane %v960_v44, 2  ;;  %s1288_s15 = sshll.u32 %s1668_s23, 3  ;;  %s1303_s16 = smul.u32 20, %s1668_s23 }
  0x3e   : > { %v947_v48 = vrot.slane %v946_v40, 2  ;;  %v968_v53 = vrot.slane %v967_v45, 2  ;;  %v1003_v54 = vrot.slane %v1002_v46, 4  ;;  %v1010_v55 = vrot.slane %v1009_v47, 4  ;;  %s1583_s19 = scalar_lea.vmem %s1658_s5, %s1288_s15 }
  0x3f   : > { %v955_v57 = vadd.f32 %v954_v49, %v953_v41  ;;  %v991_v58 = vrot.slane %v990_v50, 2  ;;  %v998_v59 = vrot.slane %v997_v51, 2  ;;  %v962_v60 = vadd.f32 %v961_v52, %v960_v44  ;;  %v621_v44 = vld [vmem:[%s1528_s14 + $0x8] sm:$0xff]  ;;  %s1589_s29 = scalar_lea.vmem %s1659_s6, %s1303_s16 }
  0x40   : > { %v948_v56 = vadd.f32 %v947_v48, %v946_v40  ;;  %v1523_v61 = vadd.f32 %v968_v53, %v967_v45  ;;  %v1004_v62 = vadd.f32 %v1003_v54, %v1002_v46  ;;  %v1011_v2 = vadd.f32 %v1010_v55, %v1009_v47 }
  0x41   : > { %v992_v0 = vadd.f32 %v991_v58, %v990_v50  ;;  %v999_v1 = vadd.f32 %v998_v59, %v997_v51  ;;  %v956_v3 = vrot.slane %v955_v57, 1  ;;  %v963_v8 = vrot.slane %v962_v60, 1 }
  0x42   : > { %v949_v63 = vrot.slane %v948_v56, 1  ;;  %v1005_v4 = vrot.slane %v1004_v62, 2  ;;  %v970_v9 = vrot.slane %v1523_v61, 1  ;;  %v1012_v15 = vrot.slane %v1011_v2, 2 }
  0x43   : > { %v993_v10 = vrot.slane %v992_v0, 1  ;;  %v1000_v11 = vrot.slane %v999_v1, 1  ;;  %v1032_v16 = vsel %vm625_vm0, %v1026_v5, 0.0  ;;  %v1039_v17 = vsel %vm625_vm0, %v1027_v6, 0.0 }
  0x44   : > { %v950_v14 = vadd.f32 %v949_v63, %v948_v56  ;;  %v957_v18 = vadd.f32 %v956_v3, %v955_v57  ;;  %v1006_v19 = vadd.f32 %v1005_v4, %v1004_v62  ;;  %v1033_v20 = vrot.slane %v1032_v16, 4  ;;  %v785_v62 = vld [vmem:[%s1506_s11 + $0x10] sm:$0xff] }
  0x45   : > { %v1040_v21 = vrot.slane %v1039_v17, 4  ;;  %v1046_v22 = vsel %vm625_vm0, %v1028_v7, 0.0  ;;  %v1053_v24 = vsel %vm625_vm0, %v1029_v12, 0.0  ;;  %v790_v25 = vrot.slane %v1511_v23, 4 }
  0x46   : > { %v1537_v26 = vsel %vm625_vm0, %v620_v13, 0.0  ;;  %v994_v28 = vadd.f32 %v993_v10, %v992_v0  ;;  %v1001_v29 = vadd.f32 %v1000_v11, %v999_v1  ;;  %v1034_v30 = vadd.f32 %v1033_v20, %v1032_v16  ;;  %v786_v10 = vld [vmem:[%s1506_s11 + $0x18] sm:$0xff] }
  0x47   : > { %v1041_v31 = vadd.f32 %v1040_v21, %v1039_v17  ;;  %668 = vadd.xlane.f32.xlu0 %v1537_v26  ;;  %v1013_v32 = vadd.f32 %v1012_v15, %v1011_v2  ;;  %v1047_v33 = vrot.slane %v1046_v22, 4  ;;  %v1054_v34 = vrot.slane %v1053_v24, 4 }
  0x48   : > { %v791_v35 = vadd.f32 %v790_v25, %v1511_v23  ;;  %v1035_v36 = vrot.slane %v1034_v30, 2  ;;  %v796_v38 = vsel %vm625_vm0, %v784_v27, 0.0  ;;  %v976_v39 = vsel %vm658_vm1, %v957_v18, %v950_v14 }
  0x49   : > { %v1042_v37 = vrot.slane %v1041_v31, 2  ;;  %v1007_v40 = vrot.slane %v1006_v19, 1  ;;  %v1048_v41 = vadd.f32 %v1047_v33, %v1046_v22  ;;  %v1055_v42 = vadd.f32 %v1054_v34, %v1053_v24  ;;  %829 = vadd.xlane.f32.xlu1 %v796_v38  ;;  %v623_v24 = vld [vmem:[%s1528_s14 + $0x18] sm:$0xff] }
  0x4a   : > { %v792_v43 = vrot.slane %v791_v35, 2  ;;  %v1036_v45 = vadd.f32 %v1035_v36, %v1034_v30  ;;  %v797_v47 = vrot.slane %v796_v38, 4  ;;  %v1020_v48 = vsel %vm658_vm1, %v1001_v29, %v994_v28 }
  0x4b   : > { %v1043_v46 = vadd.f32 %v1042_v37, %v1041_v31  ;;  %v964_v49 = vadd.f32 %v963_v8, %v962_v60  ;;  %v1049_v23 = vrot.slane %v1048_v41, 2  ;;  %v1056_v50 = vrot.slane %v1055_v42, 2  ;;  %v622_v8 = vld [vmem:[%s1528_s14 + $0x10] sm:$0xff] }
  0x4c   : > { %v793_v51 = vadd.f32 %v792_v43, %v791_v35  ;;  %v1037_v52 = vrot.slane %v1036_v45, 1  ;;  %v798_v54 = vadd.f32 %v797_v47, %v796_v38  ;;  %v633_v55 = vsel %vm625_vm0, %v621_v44, 0.0 }
  0x4d   : > { %v1044_v53 = vrot.slane %v1043_v46, 1  ;;  %v1008_v56 = vadd.f32 %v1007_v40, %v1006_v19  ;;  %v1014_v57 = vrot.slane %v1013_v32, 1  ;;  %v1050_v58 = vadd.f32 %v1049_v23, %v1048_v41  ;;  %670 = vadd.xlane.f32.xlu0 %v633_v55 }
  0x4e   : > { %v1057_v59 = vadd.f32 %v1056_v50, %v1055_v42  ;;  %v1038_v63 = vadd.f32 %v1037_v52, %v1036_v45  ;;  %v794_v1 = vrot.slane %v793_v51, 1  ;;  %v799_v60 = vrot.slane %v798_v54, 2 }
  0x4f   : > { %v1045_v0 = vadd.f32 %v1044_v53, %v1043_v46  ;;  %v1051_v2 = vrot.slane %v1050_v58, 1  ;;  %v971_v4 = vadd.f32 %v970_v9, %v1523_v61  ;;  %v803_v7 = vsel %vm625_vm0, %v785_v62, 0.0 }
  0x50   : > { %v1058_v3 = vrot.slane %v1057_v59, 1  ;;  %v800_v5 = vadd.f32 %v799_v60, %v798_v54  ;;  %v1015_v11 = vadd.f32 %v1014_v57, %v1013_v32  ;;  %v804_v14 = vrot.slane %v803_v7, 4  ;;  %831 = vadd.xlane.f32.xlu1 %v803_v7 }
  0x51   : > { %v1064_v6 = vsel %vm658_vm1, %v1045_v0, %v1038_v63  ;;  %v1052_v12 = vadd.f32 %v1051_v2, %v1050_v58  ;;  %v795_v15 = vadd.f32 %v794_v1, %v793_v51  ;;  %v977_v17 = vsel %vm660_vm2, %v964_v49, %v976_v39 }
  0x52   : > { %v1059_v13 = vadd.f32 %v1058_v3, %v1057_v59  ;;  %v801_v16 = vrot.slane %v800_v5, 1  ;;  %v1021_v18 = vsel %vm660_vm2, %v1008_v56, %v1020_v48  ;;  %v805_v61 = vadd.f32 %v804_v14, %v803_v7 }
  0x53   : > { %v1065_v9 = vsel %vm660_vm2, %v1052_v12, %v1064_v6  ;;  %v640_v19 = vsel %vm625_vm0, %v622_v8, 0.0  ;;  %v810_v20 = vsel %vm625_vm0, %v786_v10, 0.0  ;;  %v1562_v27 = vsel %vm662_vm3, %v971_v4, %v977_v17 }
  0x54   : > { %v802_v21 = vadd.f32 %v801_v16, %v800_v5  ;;  %672 = vadd.xlane.f32.xlu0 %v640_v19  ;;  %v811_v22 = vrot.slane %v810_v20, 4  ;;  %v806_v25 = vrot.slane %v805_v61, 2  ;;  %v1565_v28 = vsel %vm662_vm3, %v1015_v11, %v1021_v18  ;;  %833 = vadd.xlane.f32.xlu1 %v810_v20 }
  0x55   : > { %v1568_v29 = vsel %vm662_vm3, %v1059_v13, %v1065_v9  ;;  %v647_v33 = vsel %vm625_vm0, %v623_v24, 0.0  ;;  %v627_v38 = vrot.slane %v1537_v26, 4  ;;  %v634_v39 = vrot.slane %v633_v55, 4 }
  0x56   : > { %v821_v30 = vsel %vm658_vm1, %v802_v21, %v795_v15  ;;  %v812_v31 = vadd.f32 %v811_v22, %v810_v20  ;;  %v807_v32 = vadd.f32 %v806_v25, %v805_v61  ;;  %v641_v43 = vrot.slane %v640_v19, 4 }
  0x57   : > { %v628_v44 = vadd.f32 %v627_v38, %v1537_v26  ;;  %v635_v45 = vadd.f32 %v634_v39, %v633_v55  ;;  %v648_v47 = vrot.slane %v647_v33, 4  ;;  %v1386_v54 = vmov 0.0  }
  0x58   : > { %v813_v34 = vrot.slane %v812_v31, 2  ;;  %674 = vadd.xlane.f32.xlu0 %v647_v33  ;;  %v808_v35 = vrot.slane %v807_v32, 1  ;;  %v642_v48 = vadd.f32 %v641_v43, %v640_v19  ;;  %1293 = vmatprep.subr.mxu0 %v1386_v54  ;;  %612 = vst.msk [vmem:[%s1583_s19] sm:$0xf] %vm611_vm5, %v1386_v54  ;;  %613 = vst.msk [vmem:[%s1583_s19 + $0x4] sm:$0xf] %vm611_vm5, %v1386_v54  ;;  %v686_v10 = vlaneseq }
  0x59   : > { %v629_v49 = vrot.slane %v628_v44, 2  ;;  %v636_v23 = vrot.slane %v635_v45, 2  ;;  %v649_v50 = vadd.f32 %v648_v47, %v647_v33  ;;  %1298 = vmatprep.subr.mxu1 %v1386_v54  ;;  %1295 = vmatprep.mubr.msk.f32.mxu0 %vm1387_vm4, %v1386_v54  ;;  %615 = vst.msk [vmem:[%s1589_s29] sm:$0xf] %vm614_vm6, %v1386_v54  ;;  %616 = vst.msk [vmem:[%s1589_s29 + $0x4] sm:$0xf] %vm614_vm6, %v1386_v54 }
  0x5a   : > { %v814_v36 = vadd.f32 %v813_v34, %v812_v31  ;;  %v809_v37 = vadd.f32 %v808_v35, %v807_v32  ;;  %v643_v51 = vrot.slane %v642_v48, 2  ;;  %1300 = vmatprep.mubr.msk.f32.mxu1 %vm1387_vm4, %v1386_v54  ;;  %617 = vst.msk [vmem:[%s1589_s29 + $0x8] sm:$0xf] %vm614_vm6, %v1386_v54  ;;  %618 = vst.msk [vmem:[%s1589_s29 + $0xc] sm:$0xf] %vm614_vm6, %v1386_v54  ;;  %v687_v12 = vand.u32 127, %v686_v10 }
  0x5b   : > { %v630_v52 = vadd.f32 %v629_v49, %v628_v44  ;;  %v637_v53 = vadd.f32 %v636_v23, %v635_v45  ;;  %v650_v56 = vrot.slane %v649_v50, 2  ;;  %619 = vst.msk [vmem:[%s1589_s29 + $0x10] sm:$0xf] %vm614_vm6, %v1386_v54  ;;  %v689_v13 = vshrl.u32 %v686_v10, 7 }
  0x5c   : > { %v815_v40 = vrot.slane %v814_v36, 1  ;;  %v822_v41 = vsel %vm660_vm2, %v809_v37, %v821_v30  ;;  %v644_v57 = vadd.f32 %v643_v51, %v642_v48 }
  0x5d   : > { %v631_v26 = vrot.slane %v630_v52, 1  ;;  %v638_v55 = vrot.slane %v637_v53, 1  ;;  %v651_v58 = vadd.f32 %v650_v56, %v649_v50  ;;  %v690_v17 = vsub.s32 %v687_v12, %v689_v13 }
  0x5e   : > { %v816_v42 = vadd.f32 %v815_v40, %v814_v36  ;;  %v645_v59 = vrot.slane %v644_v57, 1 }
  0x5f   : > { %v632_v62 = vadd.f32 %v631_v26, %v630_v52  ;;  %v639_v63 = vadd.f32 %v638_v55, %v637_v53  ;;  %v652_v0 = vrot.slane %v651_v58, 1  ;;  %v1276_v53 = vld [vmem:[%s1583_s19 + $0x4] sm:$0xf]  ;;  %v681_v56 = vld [vmem:[%s1583_s19] sm:$0xf] }
  0x60   : > { %v1576_v46 = vsel %vm662_vm3, %v816_v42, %v822_v41  ;;  %v646_v1 = vadd.f32 %v645_v59, %v644_v57  ;;  %v624_v5 = vld [vmem:[%s1589_s29] sm:$0xf]  ;;  %v1274_v45 = vld [vmem:[%s1589_s29 + $0x4] sm:$0xf] }
  0x61   : > { %v659_v60 = vsel %vm658_vm1, %v639_v63, %v632_v62  ;;  %v653_v2 = vadd.f32 %v652_v0, %v651_v58  ;;  %v1280_v47 = vld [vmem:[%s1589_s29 + $0x8] sm:$0xf]  ;;  %v1282_v48 = vld [vmem:[%s1589_s29 + $0xc] sm:$0xf]  ;;  %v825_v49 = vadd.f32 %v1274_v45, %v1576_v46 }
  0x62   : > { %v661_v3 = vsel %vm660_vm2, %v646_v1, %v659_v60  ;;  %v980_v23 = vadd.f32 %v1280_v47, %v1562_v27  ;;  %v1024_v50 = vadd.f32 %v1282_v48, %v1565_v28  ;;  %v1284_v51 = vld [vmem:[%s1589_s29 + $0x10] sm:$0xf] }
  0x63   : > { %v663_v4 = vsel %vm662_vm3, %v653_v2, %v661_v3  ;;  %v1068_v52 = vadd.f32 %v1284_v51, %v1568_v29  ;;  %1275 = vst.msk [vmem:[%s1589_s29 + $0x4] sm:$0xf] %vm614_vm6, %v825_v49 }
  0x64   : > { %v665_v6 = vadd.f32 %v663_v4, %v624_v5  ;;  %1281 = vst.msk [vmem:[%s1589_s29 + $0x8] sm:$0xf] %vm614_vm6, %v980_v23  ;;  %1283 = vst.msk [vmem:[%s1589_s29 + $0xc] sm:$0xf] %vm614_vm6, %v1024_v50 }
  0x65   : > { %1285 = vst.msk [vmem:[%s1589_s29 + $0x10] sm:$0xf] %vm614_vm6, %v1068_v52 }
  0x66   : > { %667 = vst.msk [vmem:[%s1589_s29] sm:$0xf] %vm614_vm6, %v665_v6 }
  0xc6   : > { %v828_v7 = vpop.xlane.xlu1 %827 }
  0xc7   : > { %v835_v18 = vmul.f32 0.03125, %v828_v7 }
  0xc9   : > { %v848_v30 = vrot.slane %v835_v18, %v690_v17 }
  0xd4   : > { %v669_v8 = vpop.xlane.xlu0 %668 }
  0xd5   : > { %v677_v21 = vmul.f32 0.03125, %v669_v8 }
  0xd6   : > { %v830_v11 = vpop.xlane.xlu1 %829 }
  0xd7   : > { %v836_v15 = vmul.f32 0.03125, %v830_v11  ;;  %v691_v37 = vrot.slane %v677_v21, %v690_v17 }
  0xd9   : > { %v852_v19 = vrot.slane %v836_v15, %v690_v17 }
  0xda   : > { %v671_v14 = vpop.xlane.xlu0 %670 }
  0xdb   : > { %v678_v9 = vmul.f32 0.03125, %v671_v14  ;;  %v861_v36 = vsel %vm658_vm1, %v852_v19, %v848_v30 }
  0xdd   : > { %v832_v16 = vpop.xlane.xlu1 %831  ;;  %v695_v32 = vrot.slane %v678_v9, %v690_v17 }
  0xde   : > { %v837_v61 = vmul.f32 0.03125, %v832_v16 }
  0xdf   : > { %v704_v42 = vsel %vm658_vm1, %v695_v32, %v691_v37 }
  0xe0   : > { %v856_v22 = vrot.slane %v837_v61, %v690_v17 }
  0xe1   : > { %v673_v20 = vpop.xlane.xlu0 %672  ;;  %v834_v25 = vpop.xlane.xlu1 %833 }
  0xe2   : > { %v679_v24 = vmul.f32 0.03125, %v673_v20  ;;  %v838_v31 = vmul.f32 0.03125, %v834_v25  ;;  %v862_v39 = vsel %vm660_vm2, %v856_v22, %v861_v36 }
  0xe4   : > { %v699_v33 = vrot.slane %v679_v24, %v690_v17  ;;  %v860_v34 = vrot.slane %v838_v31, %v690_v17 }
  0xe5   : > { %v675_v35 = vpop.xlane.xlu0 %674 }
  0xe6   : > { %v680_v38 = vmul.f32 0.03125, %v675_v35  ;;  %v863_v40 = vsel %vm662_vm3, %v860_v34, %v862_v39  ;;  %v705_v43 = vsel %vm660_vm2, %v699_v33, %v704_v42 }
  0xe7   : > { %1299 = vmatpush3.xpose.msk.msra.mxu1 %vm707_vm7, %v863_v40 }
  0xe8   : > { %v703_v41 = vrot.slane %v680_v38, %v690_v17 }
  0xea   : > { %v706_v44 = vsel %vm662_vm3, %v703_v41, %v705_v43  ;;  %1301 = vmatmul.mubr.msk.f32.vlgmr.msra.gmra.mrb[0].mxu1 %vm707_vm7, %v863_v40 }
  0xeb   : > { %1294 = vmatpush3.xpose.msk.msra.mxu0 %vm707_vm7, %v706_v44 }
  0xee   : > { %1296 = vmatmul.mubr.msk.f32.vlgmr.msra.gmra.mrb[0].mxu0 %vm707_vm7, %v706_v44 }
 0x1bd   : > { %v932_v54 = vpop.f32.mrb[0].mxu1 }
 0x1be   : > { %v936_v46 = vadd.f32 %v1276_v53, %v932_v54  ;;  %v1302_v57 = vpop.f32.mrb[1].mxu1 }
 0x1c0   : > { %1279 = vst.msk [vmem:[%s1583_s19 + $0x4] sm:$0xf] %vm611_vm5, %v936_v46 }
 0x1c1   : > { %v776_v27 = vpop.f32.mrb[0].mxu0 }
 0x1c2   : > { %v780_v28 = vadd.f32 %v776_v27, %v681_v56  ;;  %v1297_v26 = vpop.f32.mrb[1].mxu0 }
 0x1c4   : > { %782 = vst.msk [vmem:[%s1583_s19] sm:$0xf] %vm611_vm5, %v780_v28 }
 0x1c5 PF: > { %s17_s25 = sadd.s32 1, %s1384_s25   ;;  %s1661_s21 = smov %s1372_s22 }
 0x1c6   : > { %p14_p10 = scmp.ge.s32.totalorder %s17_s25, 4   ;;  %s1662_s22 = smov %s1462_s30 }
 0x1c7   : > { %s1663_s23 = smov %s1380_s24  ;;  %s1664_s24 = smov %s1666_s26 }
 0x1c8   :  { %16 = sbr.rel (!%p14_p10) target bundleno = 3 (0x3), region = 318 }

</bundles_post_ra>
